<compile_context>
chip_gen: v7x
topology: tpu7x:2x2x1
jax: 0.10.0
libtpu: 0.0.40
codegen_flags: <defaults>
</compile_context>

<pallas_src>
import functools

import numpy as np
import jax
import jax.numpy as jnp
from jax import lax
from jax.experimental import pallas as pl
from jax.experimental.pallas import tpu as pltpu


def _round_up(x, m):
    return ((x + m - 1) // m) * m


def _band_vmem_bytes(TH, W_k, Cin_p, Cout_p, C2_p, itms, pool_it, out_it):
    """Conservative per-grid-step VMEM working-set estimate (bytes)."""
    C3, K = 3 * Cin_p, 9 * Cin_p
    Hh_t, Wh_k = TH // 2, W_k // 2
    in_blk = (TH + 4) * W_k * C3 * itms        # main + halo input blocks
    out_blk = Hh_t * Wh_k * C2_p * out_it
    band = (TH + 4) * W_k * C3 * itms          # in-kernel row concat
    patches = TH * W_k * K * itms              # im2col
    y = TH * W_k * Cout_p * 4                  # f32 conv1 result
    y_cast = TH * W_k * Cout_p * pool_it
    yh = Hh_t * W_k * Cout_p * pool_it
    pooled = 2 * Hh_t * Wh_k * Cout_p * pool_it
    z = Hh_t * Wh_k * C2_p * 4
    wgts = K * Cout_p * itms + Cout_p * C2_p * itms + (Cout_p + C2_p) * 4
    return (2 * (in_blk + out_blk) + band + patches + y + y_cast + yh
            + pooled + z + wgts)


def _choose_row_tile(H, W_k, Cin_p, Cout_p, C2_p, itms, pool_it, out_it,
                     vmem_budget, n_batch):
    """Largest TH (multiple of 4) whose working set fits the VMEM budget."""
    H4 = _round_up(max(H, 4), 4)
    th = min(H4, 256)
    if n_batch == 1 and H4 >= 8:               # keep both v7x cores busy
        th = min(th, _round_up(H4 // 2, 4))
    th -= th % 4
    while th > 4 and _band_vmem_bytes(th, W_k, Cin_p, Cout_p, C2_p,
                                      itms, pool_it, out_it) > vmem_budget:
        th -= 4
    th = max(th, 4)
    nb = -(-H4 // th)                          # keep band count, trim padding
    return _round_up(-(-H4 // nb), 4)


# ---------------------------------------------------------------------------
# Fused kernel: dilated 3x3 conv (one im2col matmul, BN & 0.25 folded in)
#               + ReLU + 2x2 sum-pool + 1x1 conv (matmul) + ReLU
# ---------------------------------------------------------------------------
def _fused_block_kernel(xm_ref, xh_ref, w1_ref, shift_ref, w2_ref, b2_ref,
                        o_ref, *, TH, W, Cin_p, Cout_p, C2_p, pool_dtype,
                        precision):
    # xm_ref:    (TH, W, 3*Cin_p)   kx-stacked input rows [t*TH, t*TH+TH)
    # xh_ref:    (4, W, 3*Cin_p)    4-row halo rows [t*TH+TH, t*TH+TH+4)
    # w1_ref:    (9*Cin_p, Cout_p)  conv1 taps, K = (ky,kx,cin); 0.25*BN folded
    # shift_ref: (1, Cout_p)        0.25*(beta + scale*(conv1_b - mean))  (f32)
    # w2_ref:    (Cout_p, C2_p)     1x1 conv weights
    # b2_ref:    (1, C2_p)          1x1 conv bias                        (f32)
    # o_ref:     (TH//2 * W//2, C2_p)
    Hh_t, Wh = TH // 2, W // 2

    # --- im2col: only cheap leading-dim ky slices + one lane concat remain in
    # the kernel (the kx taps were pre-stacked into channels by the wrapper).
    band = jnp.concatenate([xm_ref[...], xh_ref[...]], axis=0)  # (TH+4, W, 3C)
    patches = jnp.concatenate(
        [band[2 * ky:2 * ky + TH] for ky in range(3)], axis=-1)
    patches = patches.reshape(TH * W, 9 * Cin_p)

    # --- conv1 as ONE MXU matmul; BN scale & pool 1/4 already in the weights.
    y = jnp.dot(patches, w1_ref[...], preferred_element_type=jnp.float32,
                precision=precision)
    y = jnp.maximum(y + shift_ref[...], 0.0).astype(pool_dtype)

    # --- 2x2 average pool (the 1/4 is folded into w1/shift): rows, then width
    # as an add of the two 128-lane halves (Cout_p % 128 == 0).
    y4 = y.reshape(Hh_t, 2, W, Cout_p)
    yh = y4[:, 0] + y4[:, 1]                           # (Hh_t, W, Cout_p)
    yh2 = yh.reshape(Hh_t * Wh, 2 * Cout_p)
    pooled = yh2[:, :Cout_p] + yh2[:, Cout_p:]         # (Hh_t*Wh, Cout_p)

    # --- 1x1 conv (matmul) + bias + ReLU; lane-dense store (C2_p % 128 == 0).
    z = jnp.dot(pooled.astype(w2_ref.dtype), w2_ref[...],
                preferred_element_type=jnp.float32, precision=precision)
    o_ref[...] = jnp.maximum(z + b2_ref[...], 0.0).astype(o_ref.dtype)


# ---------------------------------------------------------------------------
# Wrapper: layout conversion, channel/spatial padding, BN+pool folding, tiling
# ---------------------------------------------------------------------------
def stm_renet_block_c(x_nchw, params, *, eps=1e-5,
                      compute_dtype=jnp.bfloat16, row_tile=None):
    w1 = params["conv1_w"]          # (Cout, Cin, 3, 3)
    b1 = params["conv1_b"]          # (Cout,)
    gamma, beta = params["bn_gamma"], params["bn_beta"]
    rmean, rvar = params["bn_mean"], params["bn_var"]
    w2 = params["conv2_w"]          # (C2, Cout, 1, 1)
    b2 = params["conv2_b"]          # (C2,)

    N, Cin, H, W = x_nchw.shape
    Cout, C2 = w1.shape[0], w2.shape[0]
    Hh, Wh = H // 2, W // 2         # PyTorch AvgPool2d(2,2) floors odd sizes
    f32 = jnp.float32
    cdt = np.dtype(compute_dtype)
    exact = cdt == np.dtype(jnp.float32)
    precision = lax.Precision.HIGHEST if exact else lax.Precision.DEFAULT

    # bf16 pooling only on chips with a bf16 VPU (v6e / v7x); f32 elsewhere.
    pool_dtype = f32
    if not exact:
        try:
            kind = jax.devices()[0].device_kind.lower()
        except Exception:
            kind = ""
        if not any(t in kind for t in ("v2", "v3", "v4", "v5")):
            pool_dtype = compute_dtype
    out_store_dtype = compute_dtype  # bf16 stores on the fast path

    # ---- channel padding: Cin only to a sublane multiple; Cout/C2 lane-dense
    # (Cout_p % 128 is required by the lane-half width pool; C2_p % 128 gives
    # unmasked full-lane output stores).
    Cin_p = _round_up(Cin, 8)
    Cout_p = _round_up(Cout, 128)
    C2_p = _round_up(C2, 128)
    # TODO(synk): for C2 << 128 a transposed (channels-on-sublanes) store would
    # cut output HBM bytes by ~C2_p/C2; kept lane-dense for simplicity.

    itms = cdt.itemsize
    pool_it = np.dtype(pool_dtype).itemsize
    out_it = np.dtype(out_store_dtype).itemsize

    # ---- generation-aware VMEM budget & row tiling.
    W_k = W + (W % 2)               # kernel works on an even width
    try:
        vmem_cap = int(pltpu.get_tpu_info().vmem_capacity_bytes)
    except Exception:
        vmem_cap = 64 << 20         # conservative (v7x per-TensorCore size)
    vmem_budget = max(12 << 20, int(0.45 * vmem_cap))
    if row_tile is None:
        TH = _choose_row_tile(H, W_k, Cin_p, Cout_p, C2_p, itms, pool_it,
                              out_it, vmem_budget, N)
    else:
        TH = int(row_tile)
        assert TH >= 4 and TH % 4 == 0, TH
    nT = -(-H // TH)
    H_pad = nT * TH                 # extra rows are zero-padded & sliced off
    Hh_t, Wh_k = TH // 2, W_k // 2

    # ---- input: NCHW -> NHWC, cast, pad (+2 conv halo, spatial round-up,
    # Cin -> Cin_p), then pre-stack the 3 kx taps into the channel axis:
    # x_kx[n, r, w, kx*Cin_p + c] = xp[n, r, w + 2*kx, c].
    x = jnp.transpose(x_nchw, (0, 2, 3, 1)).astype(compute_dtype)
    xp = jnp.pad(x, ((0, 0), (2, 2 + H_pad - H), (2, 2 + W_k - W),
                     (0, Cin_p - Cin)))
    x_kx = jnp.concatenate([xp[:, :, 2 * kx:2 * kx + W_k, :]
                            for kx in range(3)], axis=-1)
    # shape: (N, H_pad + 4, W_k, 3*Cin_p)

    # ---- fold eval-mode BN (+ conv1 bias) AND the 0.25 avg-pool factor into
    # the conv1 weights / shift (in f32, one final cast).  Exact because
    # ReLU(0.25 * v) == 0.25 * ReLU(v).
    inv_std = 1.0 / jnp.sqrt(rvar.astype(f32) + eps)
    s0 = gamma.astype(f32) * inv_std
    shift = 0.25 * (beta.astype(f32) + s0 * (b1.astype(f32) - rmean.astype(f32)))
    w1_t = jnp.transpose(w1, (2, 3, 1, 0)).astype(f32) * (0.25 * s0)
    w1_p = jnp.pad(w1_t, ((0, 0), (0, 0), (0, Cin_p - Cin), (0, Cout_p - Cout)))
    w1_r = w1_p.reshape(9 * Cin_p, Cout_p).astype(compute_dtype)
    shift_p = jnp.zeros((1, Cout_p), f32).at[0, :Cout].set(shift)

    # ---- conv2 (1x1) weights / bias.
    w2_t = w2.reshape(C2, Cout).T                                # (Cout, C2)
    w2_p = jnp.pad(w2_t, ((0, Cout_p - Cout), (0, C2_p - C2))).astype(compute_dtype)
    b2_p = jnp.zeros((1, C2_p), f32).at[0, :C2].set(b2.astype(f32))

    kernel = functools.partial(
        _fused_block_kernel, TH=TH, W=W_k, Cin_p=Cin_p, Cout_p=Cout_p,
        C2_p=C2_p, pool_dtype=pool_dtype, precision=precision)

    est = _band_vmem_bytes(TH, W_k, Cin_p, Cout_p, C2_p, itms, pool_it, out_it)
    vmem_limit = int(min(max(est + (4 << 20), 16 << 20), int(0.9 * vmem_cap)))

    cost = pl.CostEstimate(
        flops=2 * N * H_pad * W_k * (9 * Cin_p) * Cout_p
              + 2 * N * (H_pad // 2) * Wh_k * Cout_p * C2_p,
        transcendentals=0,
        bytes_accessed=int(x_kx.size * itms * (1.0 + 4.0 / TH)
                           + (w1_r.size + w2_p.size) * itms
                           + N * nT * Hh_t * Wh_k * C2_p * out_it))

    th_blk = TH // 4                 # halo block-index stride (4-row blocks)

    out_p = pl.pallas_call(
        kernel,
        out_shape=jax.ShapeDtypeStruct((N, nT, Hh_t * Wh_k, C2_p),
                                       out_store_dtype),
        grid=(N, nT),
        in_specs=[
            # main TH-row block of the kx-stacked input
            pl.BlockSpec((None, TH, W_k, 3 * Cin_p), lambda n, t: (n, t, 0, 0)),
            # 4-row halo from the SAME array (block size 4, TH % 4 == 0)
            pl.BlockSpec((None, 4, W_k, 3 * Cin_p),
                         lambda n, t: (n, (t + 1) * th_blk, 0, 0)),
            pl.BlockSpec((9 * Cin_p, Cout_p), lambda n, t: (0, 0)),
            pl.BlockSpec((1, Cout_p), lambda n, t: (0, 0)),
            pl.BlockSpec((Cout_p, C2_p), lambda n, t: (0, 0)),
            pl.BlockSpec((1, C2_p), lambda n, t: (0, 0)),
        ],
        out_specs=pl.BlockSpec((None, None, Hh_t * Wh_k, C2_p),
                               lambda n, t: (n, t, 0, 0)),
        compiler_params=pltpu.CompilerParams(
            dimension_semantics=("parallel", "parallel"),
            vmem_limit_bytes=vmem_limit),
        cost_estimate=cost,
    )(x_kx, x_kx, w1_r, shift_p, w2_p, b2_p)

    # (N, nT, Hh_t*Wh_k, C2_p) -> (N, Hh, Wh, C2) -> NCHW.  Layout plumbing.
    out = out_p.reshape(N, H_pad // 2, Wh_k, C2_p)[:, :Hh, :Wh, :C2]
    return jnp.transpose(out, (0, 3, 1, 2)).astype(x_nchw.dtype)


# ---------------------------------------------------------------------------
# Pure-JAX reference (same math, XLA convs) for correctness check
# ---------------------------------------------------------------------------
def ref_forward(x, params, eps=1e-5):
    hp = lax.Precision.HIGHEST
    z = lax.conv_general_dilated(
        x, params["conv1_w"], window_strides=(1, 1),
        padding=((2, 2), (2, 2)), rhs_dilation=(2, 2),
        dimension_numbers=("NCHW", "OIHW", "NCHW"), precision=hp)
    z = z + params["conv1_b"][None, :, None, None]
    inv = 1.0 / jnp.sqrt(params["bn_var"] + eps)
    z = ((z - params["bn_mean"][None, :, None, None])
         * (params["bn_gamma"] * inv)[None, :, None, None]
         + params["bn_beta"][None, :, None, None])
    z = jnp.maximum(z, 0.0)
    N, C, H, W = z.shape
    z = z[:, :, :2 * (H // 2), :2 * (W // 2)]           # AvgPool2d floor
    z = z.reshape(N, C, H // 2, 2, W // 2, 2).mean(axis=(3, 5))
    z = lax.conv_general_dilated(
        z, params["conv2_w"], window_strides=(1, 1), padding="VALID",
        dimension_numbers=("NCHW", "OIHW", "NCHW"), precision=hp)
    z = z + params["conv2_b"][None, :, None, None]
    return jnp.maximum(z, 0.0)


if __name__ == "__main__":
    key = jax.random.PRNGKey(0)
    N, Cin, H, W = 2, 4, 16, 16
    Cout, Clast = 8, 16

    ks = jax.random.split(key, 10)
    params = {
        "conv1_w": 0.1 * jax.random.normal(ks[0], (Cout, Cin, 3, 3), jnp.float32),
        "conv1_b": 0.05 * jax.random.normal(ks[1], (Cout,), jnp.float32),
        "bn_gamma": 1.0 + 0.1 * jax.random.normal(ks[2], (Cout,), jnp.float32),
        "bn_beta": 0.1 * jax.random.normal(ks[3], (Cout,), jnp.float32),
        "bn_mean": 0.1 * jax.random.normal(ks[4], (Cout,), jnp.float32),
        "bn_var": 0.5 + jax.random.uniform(ks[5], (Cout,), jnp.float32),
        "conv2_w": 0.1 * jax.random.normal(ks[6], (Clast, Cout, 1, 1), jnp.float32),
        "conv2_b": 0.05 * jax.random.normal(ks[7], (Clast,), jnp.float32),
    }
    x = jax.random.normal(ks[8], (N, Cin, H, W), jnp.float32)

    ref = jax.block_until_ready(ref_forward(x, params))

    # f32 MXU path, 2 row bands per image (exercises the halo BlockSpec path).
    f32_fwd = jax.jit(functools.partial(
        stm_renet_block_c, compute_dtype=jnp.float32, row_tile=8))
    out_f32 = jax.block_until_ready(f32_fwd(x, params))
    assert out_f32.shape == (N, Clast, H // 2, W // 2), out_f32.shape
    err_f32 = float(jnp.max(jnp.abs(out_f32 - ref)))
    assert jnp.allclose(out_f32, ref, atol=5e-3, rtol=5e-3), err_f32

    # Fast path: bf16 MXU inputs, f32 accumulation, auto-chosen row tile.
    bf16_fwd = jax.jit(stm_renet_block_c)
    out_bf16 = jax.block_until_ready(bf16_fwd(x, params))
    assert out_bf16.shape == (N, Clast, H // 2, W // 2), out_bf16.shape
    err_bf16 = float(jnp.max(jnp.abs(out_bf16 - ref)))
    assert jnp.allclose(out_bf16, ref, atol=3e-2, rtol=3e-2), err_bf16

    print("KERNEL_OK")
</pallas_src>

<mosaic_0001>
module attributes {stable_mosaic.version = 11 : i64} {
  func.func @_fused_block_kernel(%arg0: i32, %arg1: i32, %arg2: memref<1x8x16x24xf32, #tpu.memory_space<vmem>>, %arg3: memref<1x4x16x24xf32, #tpu.memory_space<vmem>>, %arg4: memref<72x128xf32, #tpu.memory_space<vmem>>, %arg5: memref<1x128xf32, #tpu.memory_space<vmem>>, %arg6: memref<128x128xf32, #tpu.memory_space<vmem>>, %arg7: memref<1x128xf32, #tpu.memory_space<vmem>>, %arg8: memref<1x1x32x128xf32, #tpu.memory_space<vmem>>) attributes {dimension_semantics = [#tpu.dimension_semantics<parallel>, #tpu.dimension_semantics<parallel>], iteration_bounds = array<i64: 2, 2>, scalar_prefetch = 0 : i64, scratch_operands = 0 : i64, tpu.core_type = #tpu.core_type<tc>, window_params = [{transform_indices = @transform_0, window_bounds = array<i64: 1, 8, 16, 24>}, {transform_indices = @transform_1, window_bounds = array<i64: 1, 4, 16, 24>}, {pipeline_mode = #tpu.pipeline_mode<synchronous>, transform_indices = @transform_2, window_bounds = array<i64: 72, 128>}, {pipeline_mode = #tpu.pipeline_mode<synchronous>, transform_indices = @transform_3, window_bounds = array<i64: 1, 128>}, {pipeline_mode = #tpu.pipeline_mode<synchronous>, transform_indices = @transform_4, window_bounds = array<i64: 128, 128>}, {pipeline_mode = #tpu.pipeline_mode<synchronous>, transform_indices = @transform_5, window_bounds = array<i64: 1, 128>}, {transform_indices = @transform_6, window_bounds = array<i64: 1, 1, 32, 128>}]} {
    %c0 = arith.constant 0 : index
    %c0_0 = arith.constant 0 : index
    %c0_1 = arith.constant 0 : index
    %c0_2 = arith.constant 0 : index
    %0 = vector.load %arg2[%c0, %c0_0, %c0_1, %c0_2] : memref<1x8x16x24xf32, #tpu.memory_space<vmem>>, vector<1x8x16x24xf32>
    %1 = vector.shape_cast %0 : vector<1x8x16x24xf32> to vector<8x16x24xf32>
    %c0_3 = arith.constant 0 : index
    %c0_4 = arith.constant 0 : index
    %c0_5 = arith.constant 0 : index
    %c0_6 = arith.constant 0 : index
    %2 = vector.load %arg3[%c0_3, %c0_4, %c0_5, %c0_6] : memref<1x4x16x24xf32, #tpu.memory_space<vmem>>, vector<1x4x16x24xf32>
    %3 = vector.shape_cast %2 : vector<1x4x16x24xf32> to vector<4x16x24xf32>
    %4 = tpu.concatenate %1, %3 in 0 : vector<8x16x24xf32>, vector<4x16x24xf32> -> vector<12x16x24xf32>
    %5 = vector.extract_strided_slice %4 {offsets = [0, 0, 0], sizes = [8, 16, 24], strides = [1, 1, 1]} : vector<12x16x24xf32> to vector<8x16x24xf32>
    %6 = vector.extract_strided_slice %4 {offsets = [2, 0, 0], sizes = [8, 16, 24], strides = [1, 1, 1]} : vector<12x16x24xf32> to vector<8x16x24xf32>
    %7 = vector.extract_strided_slice %4 {offsets = [4, 0, 0], sizes = [8, 16, 24], strides = [1, 1, 1]} : vector<12x16x24xf32> to vector<8x16x24xf32>
    %8 = tpu.concatenate %5, %6, %7 in 2 : vector<8x16x24xf32>, vector<8x16x24xf32>, vector<8x16x24xf32> -> vector<8x16x72xf32>
    %9 = vector.shape_cast %8 : vector<8x16x72xf32> to vector<128x72xf32>
    %c0_7 = arith.constant 0 : index
    %c0_8 = arith.constant 0 : index
    %10 = vector.load %arg4[%c0_7, %c0_8] : memref<72x128xf32, #tpu.memory_space<vmem>>, vector<72x128xf32>
    %cst = arith.constant dense<0.000000e+00> : vector<128x128xf32>
    %11 = tpu.matmul %9, %10, %cst {dimension_numbers = #tpu.dot_dimension_numbers<[1], [0], [0], [1], [0, 0, 1, 1], [], []>, precision = #tpu.contract_precision<fp32>} : vector<128x72xf32>, vector<72x128xf32>, vector<128x128xf32> -> vector<128x128xf32>
    %c0_9 = arith.constant 0 : index
    %c0_10 = arith.constant 0 : index
    %12 = vector.load %arg5[%c0_9, %c0_10] : memref<1x128xf32, #tpu.memory_space<vmem>>, vector<1x128xf32>
    %13 = vector.broadcast %12 : vector<1x128xf32> to vector<128x128xf32>
    %14 = arith.addf %11, %13 : vector<128x128xf32>
    %cst_11 = arith.constant 0.000000e+00 : f32
    %15 = vector.broadcast %cst_11 : f32 to vector<128x128xf32>
    %16 = arith.maximumf %14, %15 : vector<128x128xf32>
    %17 = vector.shape_cast %16 : vector<128x128xf32> to vector<4x2x16x128xf32>
    %18 = vector.extract_strided_slice %17 {offsets = [0, 0, 0, 0], sizes = [4, 1, 16, 128], strides = [1, 1, 1, 1]} : vector<4x2x16x128xf32> to vector<4x1x16x128xf32>
    %19 = vector.shape_cast %18 : vector<4x1x16x128xf32> to vector<4x16x128xf32>
    %20 = vector.extract_strided_slice %17 {offsets = [0, 1, 0, 0], sizes = [4, 1, 16, 128], strides = [1, 1, 1, 1]} : vector<4x2x16x128xf32> to vector<4x1x16x128xf32>
    %21 = vector.shape_cast %20 : vector<4x1x16x128xf32> to vector<4x16x128xf32>
    %22 = arith.addf %19, %21 : vector<4x16x128xf32>
    %23 = vector.shape_cast %22 : vector<4x16x128xf32> to vector<32x256xf32>
    %24 = vector.extract_strided_slice %23 {offsets = [0, 0], sizes = [32, 128], strides = [1, 1]} : vector<32x256xf32> to vector<32x128xf32>
    %25 = vector.extract_strided_slice %23 {offsets = [0, 128], sizes = [32, 128], strides = [1, 1]} : vector<32x256xf32> to vector<32x128xf32>
    %26 = arith.addf %24, %25 : vector<32x128xf32>
    %c0_12 = arith.constant 0 : index
    %c0_13 = arith.constant 0 : index
    %27 = vector.load %arg6[%c0_12, %c0_13] : memref<128x128xf32, #tpu.memory_space<vmem>>, vector<128x128xf32>
    %cst_14 = arith.constant dense<0.000000e+00> : vector<32x128xf32>
    %28 = tpu.matmul %26, %27, %cst_14 {dimension_numbers = #tpu.dot_dimension_numbers<[1], [0], [0], [1], [0, 0, 1, 1], [], []>, precision = #tpu.contract_precision<fp32>} : vector<32x128xf32>, vector<128x128xf32>, vector<32x128xf32> -> vector<32x128xf32>
    %c0_15 = arith.constant 0 : index
    %c0_16 = arith.constant 0 : index
    %29 = vector.load %arg7[%c0_15, %c0_16] : memref<1x128xf32, #tpu.memory_space<vmem>>, vector<1x128xf32>
    %30 = vector.broadcast %29 : vector<1x128xf32> to vector<32x128xf32>
    %31 = arith.addf %28, %30 : vector<32x128xf32>
    %cst_17 = arith.constant 0.000000e+00 : f32
    %32 = vector.broadcast %cst_17 : f32 to vector<32x128xf32>
    %33 = arith.maximumf %31, %32 : vector<32x128xf32>
    %c0_18 = arith.constant 0 : index
    %c0_19 = arith.constant 0 : index
    %c0_20 = arith.constant 0 : index
    %c0_21 = arith.constant 0 : index
    %34 = vector.load %arg8[%c0_18, %c0_19, %c0_20, %c0_21] : memref<1x1x32x128xf32, #tpu.memory_space<vmem>>, vector<1x1x32x128xf32>
    %35 = vector.shape_cast %34 : vector<1x1x32x128xf32> to vector<32x128xf32>
    %36 = vector.shape_cast %33 : vector<32x128xf32> to vector<1x1x32x128xf32>
    tpu.vector_store %arg8[%c0_18, %c0_19, %c0_20, %c0_21], %36 {strides = array<i32>} : memref<1x1x32x128xf32, #tpu.memory_space<vmem>>, vector<1x1x32x128xf32>,
    return
  }
  func.func @transform_0(%arg0: i32, %arg1: i32) -> (i32, i32, i32, i32) {
    %c0_i32 = arith.constant 0 : i32
    %c0_i32_0 = arith.constant 0 : i32
    %c0_i32_1 = arith.constant 0 : i32
    return %arg0, %arg1, %c0_i32, %c0_i32_0 : i32, i32, i32, i32
  }
  func.func @transform_1(%arg0: i32, %arg1: i32) -> (i32, i32, i32, i32) {
    %c1_i32 = arith.constant 1 : i32
    %0 = arith.addi %arg1, %c1_i32 : i32
    %c2_i32 = arith.constant 2 : i32
    %1 = arith.muli %0, %c2_i32 : i32
    %c0_i32 = arith.constant 0 : i32
    %c0_i32_0 = arith.constant 0 : i32
    %c0_i32_1 = arith.constant 0 : i32
    return %arg0, %1, %c0_i32, %c0_i32_0 : i32, i32, i32, i32
  }
  func.func @transform_2(%arg0: i32, %arg1: i32) -> (i32, i32) {
    %c0_i32 = arith.constant 0 : i32
    %c0_i32_0 = arith.constant 0 : i32
    %c0_i32_1 = arith.constant 0 : i32
    return %c0_i32, %c0_i32_0 : i32, i32
  }
  func.func @transform_3(%arg0: i32, %arg1: i32) -> (i32, i32) {
    %c0_i32 = arith.constant 0 : i32
    %c0_i32_0 = arith.constant 0 : i32
    %c0_i32_1 = arith.constant 0 : i32
    return %c0_i32, %c0_i32_0 : i32, i32
  }
  func.func @transform_4(%arg0: i32, %arg1: i32) -> (i32, i32) {
    %c0_i32 = arith.constant 0 : i32
    %c0_i32_0 = arith.constant 0 : i32
    %c0_i32_1 = arith.constant 0 : i32
    return %c0_i32, %c0_i32_0 : i32, i32
  }
  func.func @transform_5(%arg0: i32, %arg1: i32) -> (i32, i32) {
    %c0_i32 = arith.constant 0 : i32
    %c0_i32_0 = arith.constant 0 : i32
    %c0_i32_1 = arith.constant 0 : i32
    return %c0_i32, %c0_i32_0 : i32, i32
  }
  func.func @transform_6(%arg0: i32, %arg1: i32) -> (i32, i32, i32, i32) {
    %c0_i32 = arith.constant 0 : i32
    %c0_i32_0 = arith.constant 0 : i32
    %c0_i32_1 = arith.constant 0 : i32
    return %arg0, %arg1, %c0_i32, %c0_i32_0 : i32, i32, i32, i32
  }
}

</mosaic_0001>

<bundles_post_ra>
// kernel: stm_renet_block_c.1
= control target key start
LH: loop header
LB: loop body
LE: loop exit
PB: predicated region body
PF: predicated region fallthrough
CT: control target
= control target key end

     0   :  { %s4160_s21 = smov 0   ;;  %s4162_s22 = smov 0   ;;  %s5345_s0 = inlined_call_operand.vmem [shape: f32[2,20,16,24], index: 0, kind: input, shape index: {}, may-alias: {0,1}]   ;;  %s5346_s1 = inlined_call_operand.vmem [shape: f32[2,20,16,24], index: 1, kind: input, shape index: {}, may-alias: {0,1}]   ;;  %s5347_s2 = inlined_call_operand.vmem [shape: f32[72,128], index: 2, kind: input, shape index: {}]   ;;  %s5348_s3 = inlined_call_operand.vmem [shape: f32[1,128], index: 3, kind: input, shape index: {}]   ;;  %s5349_s4 = inlined_call_operand.vmem [shape: f32[128,128], index: 4, kind: input, shape index: {}]   ;;  %s5350_s5 = inlined_call_operand.vmem [shape: f32[1,128], index: 5, kind: input, shape index: {}]   ;;  %s5351_s6 = inlined_call_operand.vmem [shape: f32[2,2,32,128], index: 6, kind: output, shape index: {}]  }
   0x1   :  { %s4164_s23 = smov 0   ;;  %s4166_s24 = smov 0  }
   0x2   :  { %s4168_s25 = smov 0  }
   0x3 LB: > { %s25_s26 = sadd.s32 1, %s4112_s23  ;;  %s28_s27 = sadd.s32 1, %s4116_s24  ;;  %s4120_s25 = sphi %s4168_s25, %s16_s25   ;;  %s4116_s24 = sphi %s4166_s24, %s5437_s24   ;;  %s4112_s23 = sphi %s4164_s23, %s5436_s23   ;;  %s4108_s22 = sphi %s4162_s22, %s5435_s22   ;;  %s4104_s21 = sphi %s4160_s21, %s5434_s21  }
   0x4   : > { %p26_p0 = scmp.ge.s32.totalorder %s25_s26, 2  ;;  %p2856_p1 = scmp.ge.s32.totalorder %s4120_s25, 1 }
   0x5   : > { %p270_p2 = scmp.lt.s32.totalorder %s4120_s25, 5 }
   0x6   : > { %s5439_s26 = smov (%p26_p0, %s25_s26), 0  ;;  %s5441_s27 = smov (!%p26_p0, %s28_s27), %s4116_s24 }
   0x7   : > { %p271_p3 = pnand %p2856_p1, %p270_p2  ;;  %p30_p4 = scmp.ge.s32.totalorder %s5441_s27, 2 }
   0x9   : > { %s5443_s27 = smov (%p30_p4, %s5441_s27), 0  ;;  %274 = sbr.rel (%p271_p3) target bundleno = 978 (0x3d2), region = 44 }
  0x10   : > { %s4193_s28 = sshll.u32 %s4104_s21, 3  ;;  %p332_p5 = scmp.lt.s32.totalorder %s4108_s22, 1  ;;  %v4198_v0 = vld [vmem:[%s5347_s2] sm:$0xff]  ;;  %v4203_v1 = vld [vmem:[%s5347_s2 + $0x8] sm:$0xff]  ;;  %v4211_v4 = vld [vmem:[%s5347_s2 + $0x10] sm:$0xff]  ;;  %vm511_vm0 = vcmask 195584  }
  0x11   : > { %p334_p6 = scmp.lt.s32.totalorder %s4193_s28, 19  ;;  %v611_v2 = vand.u32 4294901760, %v4198_v0  ;;  %v614_v3 = vand.u32 4294901760, %v4203_v1  ;;  %v4218_v5 = vld [vmem:[%s5347_s2 + $0x18] sm:$0xff]  ;;  %v617_v6 = vand.u32 4294901760, %v4211_v4  ;;  %v4224_v7 = vld [vmem:[%s5347_s2 + $0x20] sm:$0xff] }
  0x12   : > { %s5445_s22 = smov (!%p332_p5, %s4108_s22), 1  ;;  %v4229_v8 = vld [vmem:[%s5347_s2 + $0x28] sm:$0xff]  ;;  %v620_v10 = vand.u32 4294901760, %v4218_v5  ;;  %v623_v11 = vand.u32 4294901760, %v4224_v7  ;;  %v4252_v14 = vld [vmem:[%s5347_s2 + $0x30] sm:$0xff]  ;;  %v4257_v15 = vld [vmem:[%s5347_s2 + $0x38] sm:$0xff] }
  0x13   : > { %s335_s17 = scalar_select %p334_p6, %s4193_s28, 19  ;;  %v4236_v9 = vpack.c.bf16 %v614_v3, %v611_v2  ;;  %v626_v12 = vand.u32 4294901760, %v4229_v8  ;;  %v629_v17 = vand.u32 4294901760, %v4252_v14  ;;  %v632_v18 = vand.u32 4294901760, %v4257_v15  ;;  %v4315_v26 = vld [vmem:[%s5347_s2 + $0x40] sm:$0xff] }
  0x14   : > { %s4038_s18 = smul.u32 40, %s5445_s22  ;;  %v4247_v13 = vpack.c.bf16 %v620_v10, %v617_v6  ;;  %s4122_s13 = smov 48   ;;  %v4322_v27 = vand.u32 4294901760, %v4315_v26  ;;  %v4382_v36 = vsub.f32 %v4198_v0, %v611_v2  ;;  %v4387_v37 = vsub.f32 %v4203_v1, %v614_v3 }
  0x15   : > { %s2858_s19 = sshll.u32 %s335_s17, 1  ;;  %3631 = vmatprep.subr.bf16.mxu0 %v4236_v9  ;;  %v4272_v16 = vpack.c.bf16 %v626_v12, %v623_v11  ;;  %s4123_s14 = smov 24   ;;  %v4298_v23 = vpack.c.bf16 %v632_v18, %v629_v17  ;;  %v4406_v42 = vsub.f32 %v4211_v4, %v617_v6  ;;  %v4411_v43 = vsub.f32 %v4218_v5, %v620_v10 }
  0x16   : > { %s338_s8 = sadd.s32 %s4038_s18, %s2858_s19  ;;  %3633 = vmatpush3.bf16.msra.mxu0 %v4236_v9  ;;  %s2879_s17 = sadd.s32 8, %s4193_s28  ;;  %v847_v38 = vand.u32 4294901760, %v4382_v36  ;;  %v854_v39 = vand.u32 4294901760, %v4387_v37  ;;  %v4430_v53 = vsub.f32 %v4224_v7, %v623_v11  ;;  %v4436_v54 = vsub.f32 %v4229_v8, %v626_v12 }
  0x17   : > { %s2859_s9 = sshll.u32 %s338_s8, 3  ;;  %3635 = vmatprep.subr.bf16.mxu0 %v4247_v13  ;;  %p352_p7 = scmp.lt.s32.totalorder %s2879_s17, 19  ;;  %v5368_v48 = vand.u32 4294901760, %v4406_v42  ;;  %v5365_v49 = vand.u32 4294901760, %v4411_v43  ;;  %v4450_v61 = vsub.f32 %v4252_v14, %v629_v17  ;;  %v4460_v1 = vsub.f32 %v4257_v15, %v632_v18 }
  0x18   : > { %s4266_s12 = scalar_lea.vmem %s5345_s0, %s2859_s9  ;;  %v848_v40 = vsub.f32 %v4382_v36, %v847_v38  ;;  %v855_v41 = vsub.f32 %v4387_v37, %v854_v39  ;;  %v5360_v57 = vand.u32 4294901760, %v4430_v53  ;;  %v5355_v58 = vand.u32 4294901760, %v4436_v54  ;;  %p364_p8 = scmp.lt.s32.totalorder %s4104_s21, 1 }
  0x19   : > { %v4277_v19 = vld [vmem:[%s4266_s12 + $0x40] sm:$0xff]  ;;  %v4287_v21 = vld [vmem:[%s4266_s12 + $0x48] sm:$0xff]  ;;  %v4305_v24 = vld [vmem:[%s4266_s12 + $0x38] sm:$0xff]  ;;  %s5447_s17 = smov (!%p352_p7, %s2879_s17), 19  ;;  %v862_v51 = vsub.f32 %v4406_v42, %v5368_v48  ;;  %v869_v52 = vsub.f32 %v4411_v43, %v5365_v49  ;;  %v5353_v3 = vand.u32 4294901760, %v4450_v61  ;;  %v5352_v5 = vand.u32 4294901760, %v4460_v1 }
  0x1a   : > { %v4280_v20 = vld [vmem:[%s4266_s12 + $0x20] sm:$0xff]  ;;  %463 = vrot.lane.b32.xlu1 %v4277_v19, %s4122_s13  ;;  %v4290_v22 = vld [vmem:[%s4266_s12 + $0x28] sm:$0xff]  ;;  %3637 = vmatpush3.bf16.msra.mxu0 %v4247_v13  ;;  %v4308_v25 = vld [vmem:[%s4266_s12 + $0x30] sm:$0xff]  ;;  %s2862_s28 = sshll.u32 %s5447_s17, 1  ;;  %v849_v46 = vand.u32 4294901760, %v848_v40  ;;  %v856_v47 = vand.u32 4294901760, %v855_v41  ;;  %v876_v60 = vsub.f32 %v4430_v53, %v5360_v57  ;;  %v883_v0 = vsub.f32 %v4436_v54, %v5355_v58 }
  0x1b   : > { %411 = vrot.lane.b32.xlu0 %v4280_v20, %s4123_s14  ;;  %3639 = vmatprep.subr.bf16.mxu0 %v4272_v16  ;;  %v4325_v28 = vld [vmem:[%s4266_s12 + $0x58] sm:$0xff]  ;;  %v4328_v29 = vld [vmem:[%s4266_s12 + $0x50] sm:$0xff]  ;;  %v4343_v30 = vld [vmem:[%s4266_s12 + $0x68] sm:$0xff]  ;;  %s356_s19 = sadd.s32 %s4038_s18, %s2862_s28  ;;  %v863_v55 = vand.u32 4294901760, %v862_v51  ;;  %v870_v56 = vand.u32 4294901760, %v869_v52  ;;  %v890_v6 = vsub.f32 %v4450_v61, %v5353_v3  ;;  %v897_v8 = vsub.f32 %v4460_v1, %v5352_v5  ;;  %s5449_s21 = smov (!%p364_p8, %s4104_s21), 1 }
  0x1c   : > { %v4346_v31 = vld [vmem:[%s4266_s12 + $0x60] sm:$0xff]  ;;  %v4359_v32 = vld [vmem:[%s4266_s12 + $0x78] sm:$0xff]  ;;  %v4362_v33 = vld [vmem:[%s4266_s12 + $0x70] sm:$0xff]  ;;  %s2863_s20 = sshll.u32 %s356_s19, 3  ;;  %v4417_v50 = vpack.c.bf16 %v856_v47, %v849_v46  ;;  %v877_v2 = vand.u32 4294901760, %v876_v60  ;;  %v884_v4 = vand.u32 4294901760, %v883_v0  ;;  %v4484_v17 = vpack.c.bf16 %v4387_v37, %v4382_v36 }
  0x1d   : > { %s4371_s7 = scalar_lea.vmem %s5346_s1, %s2863_s20  ;;  %v4442_v59 = vpack.c.bf16 %v870_v56, %v863_v55  ;;  %v891_v10 = vand.u32 4294901760, %v890_v6  ;;  %v898_v11 = vand.u32 4294901760, %v897_v8  ;;  %v4488_v18 = vpack.c.bf16 %v4411_v43, %v4406_v42  ;;  %v371_v40 = vld [vmem:[%s4266_s12] sm:$0xff]  ;;  %v372_v47 = vld [vmem:[%s4266_s12 + $0x8] sm:$0xff]  ;;  %s2864_s18 = sshll.u32 %s5449_s21, 2 }
  0x1e   : > { %465 = vrot.lane.b32.xlu1 %v4287_v21, %s4122_s13  ;;  %3641 = vmatpush3.bf16.msra.mxu0 %v4272_v16  ;;  %v388_v34 = vld [vmem:[%s4371_s7 + $0x8] sm:$0xff]  ;;  %v387_v35 = vld [vmem:[%s4371_s7] sm:$0xff]  ;;  %v390_v44 = vld [vmem:[%s4371_s7 + $0x18] sm:$0xff]  ;;  %v4469_v7 = vpack.c.bf16 %v884_v4, %v877_v2  ;;  %vm528_vm1 = vcmask 392192   ;;  %vm561_vm2 = vcmask 588800   ;;  %v5392_v37 = vand.u32 4294901760, %v4406_v42 }
  0x1f   : > { %413 = vrot.lane.b32.xlu0 %v4290_v22, %s4123_s14  ;;  %3643 = vmatprep.subr.bf16.mxu0 %v4298_v23  ;;  %v389_v45 = vld [vmem:[%s4371_s7 + $0x10] sm:$0xff]  ;;  %v392_v62 = vld [vmem:[%s4371_s7 + $0x28] sm:$0xff]  ;;  %v391_v63 = vld [vmem:[%s4371_s7 + $0x20] sm:$0xff]  ;;  %v4478_v15 = vpack.c.bf16 %v898_v11, %v891_v10  ;;  %s2865_s8 = sshll.u32 %s5445_s22, 3 }
  0x20   : > { %v394_v12 = vld [vmem:[%s4371_s7 + $0x38] sm:$0xff]  ;;  %v393_v14 = vld [vmem:[%s4371_s7 + $0x30] sm:$0xff]  ;;  %s368_s9 = sadd.s32 %s2865_s8, %s2864_s18 }
  0x21   : > { %v374_v10 = vld [vmem:[%s4266_s12 + $0x18] sm:$0xff]  ;;  %v373_v11 = vld [vmem:[%s4266_s12 + $0x10] sm:$0xff]  ;;  %s2866_s12 = sshll.u32 %s368_s9, 3 }
  0x22   : > { %417 = vrot.lane.b32.xlu1 %v4305_v24, %s4123_s14  ;;  %3645 = vmatpush3.bf16.msra.mxu0 %v4298_v23  ;;  %s370_s15 = scalar_lea.vmem %s5351_s6, %s2866_s12 }
  0x23   : > { %415 = vrot.lane.b32.xlu0 %v4308_v25, %s4123_s14  ;;  %3166 = vmatprep.subr.mxu0 %v4322_v27 }
  0x26   : > { %469 = vrot.lane.b32.xlu1 %v4325_v28, %s4122_s13  ;;  %3167 = vmatpush3.msra.mxu0 %v4322_v27 }
  0x27   : > { %467 = vrot.lane.b32.xlu0 %v4328_v29, %s4122_s13  ;;  %3647 = vmatprep.subr.bf16.mxu0 %v4417_v50 }
  0x2a   : > { %421 = vrot.lane.b32.xlu1 %v4287_v21, %s4123_s14 }
  0x2b   : > { %419 = vrot.lane.b32.xlu0 %v4277_v19, %s4123_s14 }
  0x2e   : > { %473 = vrot.lane.b32.xlu1 %v4343_v30, %s4122_s13 }
  0x2f   : > { %471 = vrot.lane.b32.xlu0 %v4346_v31, %s4122_s13 }
  0x32   : > { %425 = vrot.lane.b32.xlu1 %v4325_v28, %s4123_s14 }
  0x33   : > { %423 = vrot.lane.b32.xlu0 %v4328_v29, %s4123_s14 }
  0x36   : > { %477 = vrot.lane.b32.xlu1 %v4359_v32, %s4122_s13 }
  0x37   : > { %475 = vrot.lane.b32.xlu0 %v4362_v33, %s4122_s13 }
  0x3a   : > { %429 = vrot.lane.b32.xlu1 %v4343_v30, %s4123_s14 }
  0x3b   : > { %427 = vrot.lane.b32.xlu0 %v4346_v31, %s4123_s14 }
  0x3e   : > { %481 = vrot.lane.b32.xlu1 %v388_v34, %s4122_s13 }
  0x3f   : > { %479 = vrot.lane.b32.xlu0 %v387_v35, %s4122_s13 }
  0x42   : > { %433 = vrot.lane.b32.xlu1 %v4359_v32, %s4123_s14 }
  0x43   : > { %431 = vrot.lane.b32.xlu0 %v4362_v33, %s4123_s14 }
  0x46   : > { %485 = vrot.lane.b32.xlu1 %v390_v44, %s4122_s13 }
  0x47   : > { %483 = vrot.lane.b32.xlu0 %v389_v45, %s4122_s13 }
  0x4a   : > { %437 = vrot.lane.b32.xlu1 %v388_v34, %s4123_s14  ;;  %v4492_v34 = vpack.c.bf16 %v4436_v54, %v4430_v53 }
  0x4b   : > { %435 = vrot.lane.b32.xlu0 %v387_v35, %s4123_s14  ;;  %v4496_v35 = vpack.c.bf16 %v4460_v1, %v4450_v61 }
  0x4e   : > { %489 = vrot.lane.b32.xlu1 %v392_v62, %s4122_s13 }
  0x4f   : > { %487 = vrot.lane.b32.xlu0 %v391_v63, %s4122_s13 }
  0x52   : > { %441 = vrot.lane.b32.xlu1 %v390_v44, %s4123_s14 }
  0x53   : > { %439 = vrot.lane.b32.xlu0 %v389_v45, %s4123_s14 }
  0x56   : > { %493 = vrot.lane.b32.xlu1 %v394_v12, %s4122_s13 }
  0x57   : > { %491 = vrot.lane.b32.xlu0 %v393_v14, %s4122_s13 }
  0x8c   : > { %v464_v41 = vpop.permute.xlu1 %463 }
  0x8d   : > { %v412_v44 = vpop.permute.xlu0 %411 }
  0x8e   : > { %v512_v45 = vsel %vm511_vm0, %v371_v40, %v412_v44 }
  0x8f   : > { %v529_v46 = vsel %vm528_vm1, %v512_v45, %v464_v41 }
  0x90   : > { %v563_v51 = vsel %vm561_vm2, %v529_v46, 0  ;;  %v466_v55 = vpop.permute.xlu1 %465 }
  0x91   : > { %v4503_v52 = vand.u32 4294901760, %v563_v51  ;;  %v414_v56 = vpop.permute.xlu0 %413 }
  0x92   : > { %v513_v60 = vsel %vm511_vm0, %v372_v47, %v414_v56 }
  0x93   : > { %v530_v62 = vsel %vm528_vm1, %v513_v60, %v466_v55  ;;  %v4508_v63 = vsub.f32 %v563_v51, %v4503_v52 }
  0x94   : > { %v566_v0 = vsel %vm561_vm2, %v530_v62, 0  ;;  %v418_v4 = vpop.permute.xlu1 %417 }
  0x95   : > { %v4511_v2 = vand.u32 4294901760, %v566_v0  ;;  %v416_v6 = vpop.permute.xlu0 %415  ;;  %v5369_v8 = vand.u32 4294901760, %v4508_v63  ;;  %v515_v40 = vsel %vm511_vm0, %v374_v10, %v418_v4  ;;  %v5391_v36 = vand.u32 4294901760, %v4508_v63 }
  0x96   : > { %v514_v41 = vsel %vm511_vm0, %v373_v11, %v416_v6 }
  0x97   : > { %v4517_v12 = vsub.f32 %v566_v0, %v4511_v2  ;;  %v687_v14 = vsub.f32 %v4508_v63, %v5369_v8 }
  0x98   : > { %v470_v44 = vpop.permute.xlu1 %469 }
  0x99   : > { %v468_v45 = vpop.permute.xlu0 %467  ;;  %v688_v46 = vand.u32 4294901760, %v687_v14  ;;  %v5364_v47 = vand.u32 4294901760, %v4517_v12  ;;  %v532_v51 = vsel %vm528_vm1, %v515_v40, %v470_v44  ;;  %v4538_v14 = vsub.f32 %v4315_v26, %v4322_v27 }
  0x9a   : > { %v531_v55 = vsel %vm528_vm1, %v514_v41, %v468_v45  ;;  %v572_v56 = vsel %vm561_vm2, %v532_v51, 0 }
  0x9b   : > { %v569_v60 = vsel %vm561_vm2, %v531_v55, 0  ;;  %3168 = vmatprep.mubr.f32.mxu0 %v688_v46  ;;  %v697_v62 = vsub.f32 %v4517_v12, %v5364_v47  ;;  %v4532_v0 = vand.u32 4294901760, %v572_v56 }
  0x9c   : > { %v4534_v4 = vand.u32 4294901760, %v569_v60  ;;  %v422_v6 = vpop.permute.xlu1 %421 }
  0x9d   : > { %v420_v10 = vpop.permute.xlu0 %419  ;;  %v698_v11 = vand.u32 4294901760, %v697_v62  ;;  %v4541_v40 = vsub.f32 %v572_v56, %v4532_v0  ;;  %v517_v46 = vsel %vm511_vm0, %v4290_v22, %v422_v6  ;;  %v4555_v56 = vand.u32 4294901760, %v4538_v14 }
  0x9e   : > { %v4544_v41 = vsub.f32 %v569_v60, %v4534_v4  ;;  %v516_v26 = vsel %vm511_vm0, %v4280_v20, %v420_v10 }
  0x9f   : > { %3169 = vmatmul.mubr.f32.vlgmr.msra.gmra.mrb[0].mxu0 %v698_v11  ;;  %v5354_v45 = vand.u32 4294901760, %v4541_v40 }
  0xa0   : > { %v5361_v44 = vand.u32 4294901760, %v4544_v41  ;;  %3649 = vmatpush3.bf16.msra.mxu0 %v4417_v50  ;;  %v474_v51 = vpop.permute.xlu1 %473 }
  0xa1   : > { %v472_v55 = vpop.permute.xlu0 %471  ;;  %3651 = vmatprep.subr.bf16.mxu0 %v4442_v59  ;;  %v534_v60 = vsel %vm528_vm1, %v517_v46, %v474_v51  ;;  %v717_v22 = vsub.f32 %v4541_v40, %v5354_v45 }
  0xa2   : > { %v533_v62 = vsel %vm528_vm1, %v516_v26, %v472_v55  ;;  %v707_v50 = vsub.f32 %v4544_v41, %v5361_v44  ;;  %v578_v20 = vsel %vm561_vm2, %v534_v60, 0  ;;  %v904_v55 = vsub.f32 %v4538_v14, %v4555_v56 }
  0xa3   : > { %v575_v6 = vsel %vm561_vm2, %v533_v62, 0  ;;  %v4567_v10 = vand.u32 4294901760, %v578_v20  ;;  %v718_v46 = vand.u32 4294901760, %v717_v22 }
  0xa4   : > { %v4569_v11 = vand.u32 4294901760, %v575_v6  ;;  %v708_v5 = vand.u32 4294901760, %v707_v50  ;;  %3653 = vmatpush3.bf16.msra.mxu0 %v4442_v59  ;;  %v426_v26 = vpop.permute.xlu1 %425 }
  0xa5   : > { %v424_v51 = vpop.permute.xlu0 %423  ;;  %3655 = vmatprep.subr.bf16.mxu0 %v4469_v7  ;;  %v4576_v3 = vsub.f32 %v578_v20, %v4567_v10  ;;  %v519_v59 = vsel %vm511_vm0, %v4305_v24, %v426_v26 }
  0xa6   : > { %v4579_v60 = vsub.f32 %v575_v6, %v4569_v11  ;;  %3171 = vmatprep.mubr.f32.mxu0 %v708_v5  ;;  %v518_v22 = vsel %vm511_vm0, %v4308_v25, %v424_v51  ;;  %v905_v6 = vand.u32 4294901760, %v904_v55 }
  0xa7   : > { %3172 = vmatmul.mubr.f32.gmra.mrb[2].mxu0 %v718_v46  ;;  %v5356_v50 = vand.u32 4294901760, %v4576_v3 }
  0xa8   : > { %v5357_v62 = vand.u32 4294901760, %v4579_v60  ;;  %3657 = vmatpush3.bf16.msra.mxu0 %v4469_v7  ;;  %v478_v45 = vpop.permute.xlu1 %477  ;;  %v5399_v42 = vand.u32 4294901760, %v4579_v60 }
  0xa9   : > { %v476_v20 = vpop.permute.xlu0 %475  ;;  %3659 = vmatprep.subr.bf16.mxu0 %v4478_v15  ;;  %v536_v5 = vsel %vm528_vm1, %v519_v59, %v478_v45  ;;  %v737_v24 = vsub.f32 %v4576_v3, %v5356_v50 }
  0xaa   : > { %v535_v46 = vsel %vm528_vm1, %v518_v22, %v476_v20  ;;  %v727_v58 = vsub.f32 %v4579_v60, %v5357_v62  ;;  %v584_v7 = vsel %vm561_vm2, %v536_v5, 0 }
  0xab   : > { %v581_v25 = vsel %vm561_vm2, %v535_v46, 0  ;;  %v4599_v26 = vand.u32 4294901760, %v584_v7  ;;  %v738_v45 = vand.u32 4294901760, %v737_v24 }
  0xac   : > { %v4601_v51 = vand.u32 4294901760, %v581_v25  ;;  %v728_v55 = vand.u32 4294901760, %v727_v58  ;;  %3661 = vmatpush3.bf16.msra.mxu0 %v4478_v15  ;;  %v430_v59 = vpop.permute.xlu1 %429 }
  0xad   : > { %v428_v22 = vpop.permute.xlu0 %427  ;;  %3208 = vmatprep.subr.mxu0 %v905_v6  ;;  %v4605_v20 = vsub.f32 %v584_v7, %v4599_v26  ;;  %v521_v58 = vsel %vm511_vm0, %v4287_v21, %v430_v59 }
  0xae   : > { %v4608_v50 = vsub.f32 %v581_v25, %v4601_v51  ;;  %3174 = vmatprep.mubr.f32.mxu0 %v728_v55  ;;  %v520_v15 = vsel %vm511_vm0, %v4277_v19, %v428_v22 }
  0xaf   : > { %3175 = vmatmul.mubr.f32.gmra.mrb[4].mxu0 %v738_v45  ;;  %v5359_v46 = vand.u32 4294901760, %v4605_v20 }
  0xb0   : > { %v5358_v5 = vand.u32 4294901760, %v4608_v50  ;;  %3209 = vmatpush3.msra.mxu0 %v905_v6  ;;  %v482_v24 = vpop.permute.xlu1 %481 }
  0xb1   : > { %v480_v62 = vpop.permute.xlu0 %479  ;;  %3663 = vmatprep.subr.bf16.mxu0 %v4484_v17  ;;  %v538_v7 = vsel %vm528_vm1, %v521_v58, %v482_v24  ;;  %v757_v6 = vsub.f32 %v4605_v20, %v5359_v46 }
  0xb2   : > { %v537_v25 = vsel %vm528_vm1, %v520_v15, %v480_v62  ;;  %v747_v55 = vsub.f32 %v4608_v50, %v5358_v5  ;;  %v590_v21 = vsel %vm561_vm2, %v538_v7, 0 }
  0xb3   : > { %v587_v19 = vsel %vm561_vm2, %v537_v25, 0  ;;  %v4627_v45 = vand.u32 4294901760, %v590_v21  ;;  %v758_v58 = vand.u32 4294901760, %v757_v6 }
  0xb4   : > { %v4629_v59 = vand.u32 4294901760, %v587_v19  ;;  %v748_v22 = vand.u32 4294901760, %v747_v55  ;;  %v434_v24 = vpop.permute.xlu1 %433 }
  0xb5   : > { %v432_v62 = vpop.permute.xlu0 %431  ;;  %v4632_v15 = vsub.f32 %v590_v21, %v4627_v45  ;;  %v523_v46 = vsel %vm511_vm0, %v4325_v28, %v434_v24 }
  0xb6   : > { %v4635_v5 = vsub.f32 %v587_v19, %v4629_v59  ;;  %3177 = vmatprep.mubr.f32.mxu0 %v748_v22  ;;  %v522_v55 = vsel %vm511_vm0, %v4328_v29, %v432_v62 }
  0xb7   : > { %3178 = vmatmul.mubr.f32.gmra.mrb[6].mxu0 %v758_v58  ;;  %v5363_v25 = vand.u32 4294901760, %v4632_v15 }
  0xb8   : > { %v5362_v7 = vand.u32 4294901760, %v4635_v5  ;;  %v486_v6 = vpop.permute.xlu1 %485 }
  0xb9   : > { %v484_v57 = vpop.permute.xlu0 %483  ;;  %v540_v21 = vsel %vm528_vm1, %v523_v46, %v486_v6  ;;  %v777_v22 = vsub.f32 %v4632_v15, %v5363_v25 }
  0xba   : > { %v539_v44 = vsel %vm528_vm1, %v522_v55, %v484_v57  ;;  %v767_v19 = vsub.f32 %v4635_v5, %v5362_v7  ;;  %v596_v58 = vsel %vm561_vm2, %v540_v21, 0 }
  0xbb   : > { %v593_v28 = vsel %vm561_vm2, %v539_v44, 0  ;;  %v4653_v24 = vand.u32 4294901760, %v596_v58  ;;  %v778_v46 = vand.u32 4294901760, %v777_v22 }
  0xbc   : > { %v4655_v29 = vand.u32 4294901760, %v593_v28  ;;  %v768_v62 = vand.u32 4294901760, %v767_v19  ;;  %v438_v6 = vpop.permute.xlu1 %437 }
  0xbd   : > { %v436_v57 = vpop.permute.xlu0 %435  ;;  %v4658_v55 = vsub.f32 %v596_v58, %v4653_v24  ;;  %v525_v25 = vsel %vm511_vm0, %v4343_v30, %v438_v6 }
  0xbe   : > { %v4661_v7 = vsub.f32 %v593_v28, %v4655_v29  ;;  %3180 = vmatprep.mubr.f32.mxu0 %v768_v62  ;;  %v524_v19 = vsel %vm511_vm0, %v4346_v31, %v436_v57 }
  0xbf   : > { %3181 = vmatmul.mubr.f32.gmra.mrb[8].mxu0 %v778_v46  ;;  %v5367_v44 = vand.u32 4294901760, %v4658_v55 }
  0xc0   : > { %v5366_v21 = vand.u32 4294901760, %v4661_v7  ;;  %v490_v22 = vpop.permute.xlu1 %489 }
  0xc1   : > { %v488_v47 = vpop.permute.xlu0 %487  ;;  %v542_v58 = vsel %vm528_vm1, %v525_v25, %v490_v22  ;;  %v797_v62 = vsub.f32 %v4658_v55, %v5367_v44 }
  0xc2   : > { %v541_v49 = vsel %vm528_vm1, %v524_v19, %v488_v47  ;;  %v787_v28 = vsub.f32 %v4661_v7, %v5366_v21  ;;  %v602_v46 = vsel %vm561_vm2, %v542_v58, 0 }
  0xc3   : > { %v599_v30 = vsel %vm561_vm2, %v541_v49, 0  ;;  %v4679_v6 = vand.u32 4294901760, %v602_v46  ;;  %v798_v25 = vand.u32 4294901760, %v797_v62 }
  0xc4   : > { %v4681_v31 = vand.u32 4294901760, %v599_v30  ;;  %v788_v57 = vand.u32 4294901760, %v787_v28  ;;  %v442_v22 = vpop.permute.xlu1 %441 }
  0xc5   : > { %v440_v47 = vpop.permute.xlu0 %439  ;;  %v4684_v19 = vsub.f32 %v602_v46, %v4679_v6  ;;  %v527_v44 = vsel %vm511_vm0, %v4359_v32, %v442_v22 }
  0xc6   : > { %v4687_v21 = vsub.f32 %v599_v30, %v4681_v31  ;;  %3183 = vmatprep.mubr.f32.mxu0 %v788_v57  ;;  %v526_v28 = vsel %vm511_vm0, %v4362_v33, %v440_v47 }
  0xc7   : > { %3184 = vmatmul.mubr.f32.gmra.mrb[10].mxu0 %v798_v25  ;;  %v816_v49 = vand.u32 4294901760, %v4684_v19 }
  0xc8   : > { %v806_v58 = vand.u32 4294901760, %v4687_v21  ;;  %v494_v62 = vpop.permute.xlu1 %493 }
  0xc9   : > { %v492_v48 = vpop.permute.xlu0 %491  ;;  %v544_v46 = vsel %vm528_vm1, %v527_v44, %v494_v62  ;;  %v817_v57 = vsub.f32 %v4684_v19, %v816_v49 }
  0xca   : > { %v543_v8 = vsel %vm528_vm1, %v526_v28, %v492_v48  ;;  %v807_v30 = vsub.f32 %v4687_v21, %v806_v58  ;;  %v608_v25 = vsel %vm561_vm2, %v544_v46, 0 }
  0xcb   : > { %v605_v32 = vsel %vm561_vm2, %v543_v8, 0  ;;  %v4705_v22 = vand.u32 4294901760, %v608_v25  ;;  %v818_v44 = vand.u32 4294901760, %v817_v57 }
  0xcc   : > { %v4707_v33 = vand.u32 4294901760, %v605_v32  ;;  %v808_v47 = vand.u32 4294901760, %v807_v30 }
  0xcd   : > { %v4710_v48 = vsub.f32 %v608_v25, %v4705_v22 }
  0xce   : > { %v4713_v28 = vsub.f32 %v605_v32, %v4707_v33  ;;  %3186 = vmatprep.mubr.f32.mxu0 %v808_v47  ;;  %v5402_v47 = vand.u32 4294901760, %v4576_v3 }
  0xcf   : > { %3187 = vmatmul.mubr.f32.gmra.mrb[12].mxu0 %v818_v44  ;;  %v836_v46 = vand.u32 4294901760, %v4710_v48 }
  0xd0   : > { %v826_v62 = vand.u32 4294901760, %v4713_v28 }
  0xd1   : > { %v837_v30 = vsub.f32 %v4710_v48, %v836_v46 }
  0xd2   : > { %v827_v8 = vsub.f32 %v4713_v28, %v826_v62 }
  0xd3   : > { %v838_v25 = vand.u32 4294901760, %v837_v30 }
  0xd4   : > { %v828_v57 = vand.u32 4294901760, %v827_v8  ;;  %v4968_v8 = vld [vmem:[%s5349_s4 + $0x78] sm:$0xff] }
  0xd6   : > { %3189 = vmatprep.mubr.f32.mxu0 %v828_v57  ;;  %v2002_v57 = vand.u32 4294901760, %v4968_v8 }
  0xd7   : > { %3190 = vmatmul.mubr.f32.gmra.mrb[14].mxu0 %v838_v25 }
  0xd8   : > { %3210 = vmatprep.mubr.f32.mxu0 %v4503_v52 }
  0xdb   : > { %3211 = vmatmul.mubr.f32.vlgmr.msra.gmra.mrb[0].mxu0 %v4511_v2 }
  0xdc   : > { %3665 = vmatpush3.bf16.msra.mxu0 %v4484_v17  ;;  %3213 = vmatprep.mubr.f32.mxu0 %v4534_v4  ;;  %v3694_v17 = vpack.c.bf16 %v854_v39, %v847_v38  ;;  %v5393_v38 = vand.u32 4294901760, %v4411_v43  ;;  %v5400_v43 = vand.u32 4294901760, %v4450_v61  ;;  %v5406_v61 = vand.u32 4294901760, %v4632_v15 }
  0xdd   : > { %3667 = vmatprep.subr.bf16.mxu0 %v4488_v18 }
  0xde   : > { %v3698_v39 = vpack.c.bf16 %v5393_v38, %v5392_v37 }
  0xdf   : > { %3214 = vmatmul.mubr.f32.gmra.mrb[2].mxu0 %v4532_v0 }
  0xe0   : > { %3216 = vmatprep.mubr.f32.mxu0 %v4569_v11  ;;  %3669 = vmatpush3.bf16.msra.mxu0 %v4488_v18  ;;  %v5394_v18 = vand.u32 4294901760, %v4517_v12 }
  0xe1   : > { %3671 = vmatprep.subr.bf16.mxu0 %v4492_v34 }
  0xe3   : > { %3217 = vmatmul.mubr.f32.gmra.mrb[4].mxu0 %v4567_v10 }
  0xe4   : > { %3219 = vmatprep.mubr.f32.mxu0 %v4601_v51  ;;  %3673 = vmatpush3.bf16.msra.mxu0 %v4492_v34  ;;  %v5395_v34 = vand.u32 4294901760, %v4544_v41 }
  0xe5   : > { %3675 = vmatprep.subr.bf16.mxu0 %v4496_v35 }
  0xe7   : > { %3220 = vmatmul.mubr.f32.gmra.mrb[6].mxu0 %v4599_v26 }
  0xe8   : > { %3222 = vmatprep.mubr.f32.mxu0 %v4629_v59  ;;  %3677 = vmatpush3.bf16.msra.mxu0 %v4496_v35  ;;  %v5396_v35 = vand.u32 4294901760, %v4430_v53  ;;  %v5403_v53 = vand.u32 4294901760, %v4608_v50 }
  0xe9   : > { %3250 = vmatprep.subr.mxu0 %v4538_v14 }
  0xeb   : > { %3223 = vmatmul.mubr.f32.gmra.mrb[8].mxu0 %v4627_v45 }
  0xec   : > { %3225 = vmatprep.mubr.f32.mxu0 %v4655_v29  ;;  %3251 = vmatpush3.msra.mxu0 %v4538_v14  ;;  %v5397_v14 = vand.u32 4294901760, %v4436_v54  ;;  %v5404_v54 = vand.u32 4294901760, %v4605_v20 }
  0xed   : > { %3679 = vmatprep.subr.bf16.mxu0 %v4236_v9 }
  0xee   : > { %v3702_v32 = vpack.c.bf16 %v5397_v14, %v5396_v35 }
  0xef   : > { %3226 = vmatmul.mubr.f32.gmra.mrb[10].mxu0 %v4653_v24 }
  0xf0   : > { %3228 = vmatprep.mubr.f32.mxu0 %v4681_v31 }
  0xf3   : > { %3229 = vmatmul.mubr.f32.gmra.mrb[12].mxu0 %v4679_v6 }
  0xf4   : > { %3231 = vmatprep.mubr.f32.mxu0 %v4707_v33 }
  0xf7   : > { %3232 = vmatmul.mubr.f32.gmra.mrb[14].mxu0 %v4705_v22 }
  0xf8   : > { %3252 = vmatprep.mubr.f32.mxu0 %v4508_v63  ;;  %v5398_v63 = vand.u32 4294901760, %v4541_v40 }
  0xfb   : > { %3253 = vmatmul.mubr.f32.vlgmr.msra.gmra.mrb[0].mxu0 %v4517_v12  ;;  %v5401_v12 = vand.u32 4294901760, %v4460_v1  ;;  %v5407_v1 = vand.u32 4294901760, %v4661_v7 }
  0xfc   : > { %3681 = vmatpush3.bf16.msra.mxu0 %v4236_v9  ;;  %3255 = vmatprep.mubr.f32.mxu0 %v4544_v41 }
  0xfd   : > { %3683 = vmatprep.subr.bf16.mxu0 %v4247_v13  ;;  %v3706_v41 = vpack.c.bf16 %v5401_v12, %v5400_v43 }
  0xff   : > { %3256 = vmatmul.mubr.f32.gmra.mrb[2].mxu0 %v4541_v40  ;;  %v5405_v40 = vand.u32 4294901760, %v4635_v5 }
 0x100   : > { %3258 = vmatprep.mubr.f32.mxu0 %v4579_v60  ;;  %3685 = vmatpush3.bf16.msra.mxu0 %v4247_v13 }
 0x101   : > { %3687 = vmatprep.subr.bf16.mxu0 %v4272_v16 }
 0x103   : > { %3259 = vmatmul.mubr.f32.gmra.mrb[4].mxu0 %v4576_v3  ;;  %v5408_v3 = vand.u32 4294901760, %v4658_v55 }
 0x104   : > { %3261 = vmatprep.mubr.f32.mxu0 %v4608_v50  ;;  %3689 = vmatpush3.bf16.msra.mxu0 %v4272_v16 }
 0x105   : > { %3691 = vmatprep.subr.bf16.mxu0 %v4298_v23 }
 0x107   : > { %3262 = vmatmul.mubr.f32.gmra.mrb[6].mxu0 %v4605_v20  ;;  %v1924_v20 = vld [vmem:[%s5349_s4 + $0x38] sm:$0xff] }
 0x108   : > { %3264 = vmatprep.mubr.f32.mxu0 %v4635_v5  ;;  %3693 = vmatpush3.bf16.msra.mxu0 %v4298_v23 }
 0x109   : > { %3292 = vmatprep.subr.mxu0 %v4322_v27 }
 0x10b   : > { %3265 = vmatmul.mubr.f32.gmra.mrb[8].mxu0 %v4632_v15  ;;  %v4907_v15 = vld [vmem:[%s5349_s4 + $0x40] sm:$0xff] }
 0x10c   : > { %3267 = vmatprep.mubr.f32.mxu0 %v4661_v7  ;;  %3293 = vmatpush3.msra.mxu0 %v4322_v27  ;;  %v4912_v7 = vld [vmem:[%s5349_s4 + $0x48] sm:$0xff] }
 0x10d   : > { %3695 = vmatprep.subr.bf16.mxu0 %v3694_v17 }
 0x10f   : > { %3268 = vmatmul.mubr.f32.gmra.mrb[10].mxu0 %v4658_v55 }
 0x110   : > { %3270 = vmatprep.mubr.f32.mxu0 %v4687_v21  ;;  %v4923_v21 = vld [vmem:[%s5349_s4 + $0x50] sm:$0xff] }
 0x113   : > { %3271 = vmatmul.mubr.f32.gmra.mrb[12].mxu0 %v4684_v19 }
 0x114   : > { %3273 = vmatprep.mubr.f32.mxu0 %v4713_v28 }
 0x117   : > { %3274 = vmatmul.mubr.f32.gmra.mrb[14].mxu0 %v4710_v48 }
 0x118   : > { %3294 = vmatprep.mubr.f32.mxu0 %v5391_v36 }
 0x11b   : > { %3295 = vmatmul.mubr.f32.vlgmr.msra.gmra.mrb[0].mxu0 %v5394_v18 }
 0x11c   : > { %3697 = vmatpush3.bf16.msra.mxu0 %v3694_v17  ;;  %3297 = vmatprep.mubr.f32.mxu0 %v5395_v34 }
 0x11d   : > { %3699 = vmatprep.subr.bf16.mxu0 %v3698_v39 }
 0x11f   : > { %3298 = vmatmul.mubr.f32.gmra.mrb[2].mxu0 %v5398_v63 }
 0x120   : > { %3300 = vmatprep.mubr.f32.mxu0 %v5399_v42  ;;  %3701 = vmatpush3.bf16.msra.mxu0 %v3698_v39 }
 0x121   : > { %3703 = vmatprep.subr.bf16.mxu0 %v3702_v32 }
 0x123   : > { %3301 = vmatmul.mubr.f32.gmra.mrb[4].mxu0 %v5402_v47 }
 0x124   : > { %3303 = vmatprep.mubr.f32.mxu0 %v5403_v53  ;;  %3705 = vmatpush3.bf16.msra.mxu0 %v3702_v32 }
 0x125   : > { %3707 = vmatprep.subr.bf16.mxu0 %v3706_v41 }
 0x127   : > { %3304 = vmatmul.mubr.f32.gmra.mrb[6].mxu0 %v5404_v54 }
 0x128   : > { %3306 = vmatprep.mubr.f32.mxu0 %v5405_v40  ;;  %3709 = vmatpush3.bf16.msra.mxu0 %v3706_v41 }
 0x129   : > { %3334 = vmatprep.subr.mxu0 %v4555_v56 }
 0x12b   : > { %3307 = vmatmul.mubr.f32.gmra.mrb[8].mxu0 %v5406_v61 }
 0x12c   : > { %3309 = vmatprep.mubr.f32.mxu0 %v5407_v1  ;;  %3335 = vmatpush3.msra.mxu0 %v4555_v56 }
 0x12d   : > { %3711 = vmatprep.subr.bf16.mxu0 %v4236_v9 }
 0x12f   : > { %3310 = vmatmul.mubr.f32.gmra.mrb[10].mxu0 %v5408_v3 }
 0x130   : > { %3312 = vmatprep.mubr.f32.mxu0 %v806_v58 }
 0x133   : > { %3313 = vmatmul.mubr.f32.gmra.mrb[12].mxu0 %v816_v49  ;;  %v4939_v49 = vld [vmem:[%s5349_s4 + $0x60] sm:$0xff] }
 0x134   : > { %3315 = vmatprep.mubr.f32.mxu0 %v826_v62 }
 0x137   : > { %3316 = vmatmul.mubr.f32.gmra.mrb[14].mxu0 %v836_v46  ;;  %v4963_v46 = vld [vmem:[%s5349_s4 + $0x70] sm:$0xff] }
 0x138   : > { %3336 = vmatprep.mubr.f32.mxu0 %v4503_v52  ;;  %v1999_v30 = vand.u32 4294901760, %v4963_v46 }
 0x13a   : > { %v4980_v36 = vpack.c.bf16 %v2002_v57, %v1999_v30 }
 0x13b   : > { %3337 = vmatmul.mubr.f32.vlgmr.msra.gmra.mrb[0].mxu0 %v4511_v2 }
 0x13c   : > { %3713 = vmatpush3.bf16.msra.mxu0 %v4236_v9  ;;  %3339 = vmatprep.mubr.f32.mxu0 %v4534_v4  ;;  %v1917_v9 = vld [vmem:[%s5349_s4] sm:$0xff] }
 0x13d   : > { %3715 = vmatprep.subr.bf16.mxu0 %v4247_v13 }
 0x13f   : > { %3340 = vmatmul.mubr.f32.gmra.mrb[2].mxu0 %v4532_v0 }
 0x140   : > { %3342 = vmatprep.mubr.f32.mxu0 %v4569_v11  ;;  %3717 = vmatpush3.bf16.msra.mxu0 %v4247_v13  ;;  %v1918_v13 = vld [vmem:[%s5349_s4 + $0x8] sm:$0xff] }
 0x141   : > { %3719 = vmatprep.subr.bf16.mxu0 %v4272_v16 }
 0x143   : > { %3343 = vmatmul.mubr.f32.gmra.mrb[4].mxu0 %v4567_v10 }
 0x144   : > { %3345 = vmatprep.mubr.f32.mxu0 %v4601_v51  ;;  %3721 = vmatpush3.bf16.msra.mxu0 %v4272_v16  ;;  %v1957_v16 = vand.u32 4294901760, %v1917_v9 }
 0x145   : > { %3723 = vmatprep.subr.bf16.mxu0 %v4298_v23 }
 0x146   : > { %v4956_v28 = vsub.f32 %v1917_v9, %v1957_v16 }
 0x147   : > { %3346 = vmatmul.mubr.f32.gmra.mrb[6].mxu0 %v4599_v26 }
 0x148   : > { %3348 = vmatprep.mubr.f32.mxu0 %v4629_v59  ;;  %3725 = vmatpush3.bf16.msra.mxu0 %v4298_v23  ;;  %v1960_v23 = vand.u32 4294901760, %v1918_v13  ;;  %v5385_v25 = vand.u32 4294901760, %v4956_v28 }
 0x149   : > { %3376 = vmatprep.subr.mxu0 %v4322_v27 }
 0x14a   : > { %v4958_v62 = vsub.f32 %v1918_v13, %v1960_v23  ;;  %v2081_v37 = vsub.f32 %v4956_v28, %v5385_v25 }
 0x14b   : > { %3349 = vmatmul.mubr.f32.gmra.mrb[8].mxu0 %v4627_v45 }
 0x14c   : > { %3351 = vmatprep.mubr.f32.mxu0 %v4655_v29  ;;  %3377 = vmatpush3.msra.mxu0 %v4322_v27  ;;  %v4872_v27 = vpack.c.bf16 %v1960_v23, %v1957_v16  ;;  %v5384_v17 = vand.u32 4294901760, %v4958_v62  ;;  %v2082_v34 = vand.u32 4294901760, %v2081_v37 }
 0x14e   : > { %3727 = vmatprep.subr.bf16.mxu1 %v4872_v27  ;;  %v2088_v38 = vsub.f32 %v4958_v62, %v5384_v17 }
 0x14f   : > { %3352 = vmatmul.mubr.f32.gmra.mrb[10].mxu0 %v4653_v24  ;;  %3729 = vmatpush3.bf16.msra.mxu1 %v4872_v27 }
 0x150   : > { %3354 = vmatprep.mubr.f32.mxu0 %v4681_v31  ;;  %v2089_v35 = vand.u32 4294901760, %v2088_v38 }
 0x152   : > { %v4996_v63 = vpack.c.bf16 %v2089_v35, %v2082_v34 }
 0x153   : > { %3355 = vmatmul.mubr.f32.gmra.mrb[12].mxu0 %v4679_v6 }
 0x154   : > { %3357 = vmatprep.mubr.f32.mxu0 %v4707_v33 }
 0x157   : > { %3358 = vmatmul.mubr.f32.gmra.mrb[14].mxu0 %v4705_v22 }
 0x158   : > { %3378 = vmatprep.mubr.f32.mxu0 %v4503_v52  ;;  %v1919_v52 = vld [vmem:[%s5349_s4 + $0x10] sm:$0xff] }
 0x15b   : > { %3379 = vmatmul.mubr.f32.vlgmr.msra.gmra.mrb[0].mxu0 %v4511_v2  ;;  %v1920_v2 = vld [vmem:[%s5349_s4 + $0x18] sm:$0xff] }
 0x15c   : > { %3381 = vmatprep.mubr.f32.mxu0 %v4534_v4  ;;  %v1966_v4 = vand.u32 4294901760, %v1920_v2 }
 0x15e   : > { %v4990_v18 = vsub.f32 %v1920_v2, %v1966_v4 }
 0x15f   : > { %3382 = vmatmul.mubr.f32.gmra.mrb[2].mxu0 %v4532_v0  ;;  %v1963_v0 = vand.u32 4294901760, %v1919_v52 }
 0x160   : > { %3384 = vmatprep.mubr.f32.mxu0 %v4569_v11  ;;  %v1922_v11 = vld [vmem:[%s5349_s4 + $0x28] sm:$0xff]  ;;  %v5382_v32 = vand.u32 4294901760, %v4990_v18 }
 0x161   : > { %v4882_v56 = vpack.c.bf16 %v1966_v4, %v1963_v0  ;;  %v1972_v50 = vand.u32 4294901760, %v1922_v11  ;;  %v4988_v39 = vsub.f32 %v1919_v52, %v1963_v0 }
 0x162   : > { %v2102_v43 = vsub.f32 %v4990_v18, %v5382_v32 }
 0x163   : > { %3385 = vmatmul.mubr.f32.gmra.mrb[4].mxu0 %v4567_v10  ;;  %v1921_v10 = vld [vmem:[%s5349_s4 + $0x20] sm:$0xff]  ;;  %3731 = vmatprep.subr.bf16.mxu1 %v4882_v56  ;;  %v5383_v14 = vand.u32 4294901760, %v4988_v39  ;;  %v5006_v41 = vsub.f32 %v1922_v11, %v1972_v50 }
 0x164   : > { %3387 = vmatprep.mubr.f32.mxu0 %v4601_v51  ;;  %v1969_v60 = vand.u32 4294901760, %v1921_v10  ;;  %3733 = vmatpush3.bf16.msra.mxu1 %v4882_v56  ;;  %v1923_v51 = vld [vmem:[%s5349_s4 + $0x30] sm:$0xff]  ;;  %v2103_v53 = vand.u32 4294901760, %v2102_v43 }
 0x165   : > { %v1975_v5 = vand.u32 4294901760, %v1923_v51  ;;  %v2095_v42 = vsub.f32 %v4988_v39, %v5383_v14  ;;  %v5380_v40 = vand.u32 4294901760, %v5006_v41 }
 0x166   : > { %v5004_v12 = vsub.f32 %v1921_v10, %v1969_v60 }
 0x167   : > { %3388 = vmatmul.mubr.f32.gmra.mrb[6].mxu0 %v4599_v26  ;;  %v4892_v26 = vpack.c.bf16 %v1972_v50, %v1969_v60  ;;  %v2096_v47 = vand.u32 4294901760, %v2095_v42  ;;  %v2116_v3 = vsub.f32 %v5006_v41, %v5380_v40  ;;  %v5019_v9 = vsub.f32 %v1923_v51, %v1975_v5 }
 0x168   : > { %3390 = vmatprep.mubr.f32.mxu0 %v4629_v59  ;;  %v5381_v54 = vand.u32 4294901760, %v5004_v12 }
 0x169   : > { %3735 = vmatprep.subr.bf16.mxu1 %v4892_v26  ;;  %v5011_v61 = vpack.c.bf16 %v2103_v53, %v2096_v47  ;;  %v2117_v23 = vand.u32 4294901760, %v2116_v3  ;;  %v5379_v52 = vand.u32 4294901760, %v5019_v9 }
 0x16a   : > { %3737 = vmatpush3.bf16.msra.mxu1 %v4892_v26  ;;  %v2109_v1 = vsub.f32 %v5004_v12, %v5381_v54 }
 0x16b   : > { %3391 = vmatmul.mubr.f32.gmra.mrb[8].mxu0 %v4627_v45  ;;  %v1978_v45 = vand.u32 4294901760, %v1924_v20  ;;  %v2123_v4 = vsub.f32 %v5019_v9, %v5379_v52 }
 0x16c   : > { %3393 = vmatprep.mubr.f32.mxu0 %v4655_v29  ;;  %v1984_v29 = vand.u32 4294901760, %v4912_v7  ;;  %v2110_v16 = vand.u32 4294901760, %v2109_v1 }
 0x16d   : > { %v4902_v59 = vpack.c.bf16 %v1978_v45, %v1975_v5  ;;  %v5021_v13 = vsub.f32 %v1924_v20, %v1978_v45  ;;  %v2124_v50 = vand.u32 4294901760, %v2123_v4 }
 0x16e   : > { %v5025_v0 = vpack.c.bf16 %v2117_v23, %v2110_v16  ;;  %v5034_v11 = vsub.f32 %v4912_v7, %v1984_v29 }
 0x16f   : > { %3394 = vmatmul.mubr.f32.gmra.mrb[10].mxu0 %v4653_v24  ;;  %3739 = vmatprep.subr.bf16.mxu1 %v4902_v59  ;;  %v1981_v24 = vand.u32 4294901760, %v4907_v15  ;;  %v5378_v2 = vand.u32 4294901760, %v5021_v13 }
 0x170   : > { %3396 = vmatprep.mubr.f32.mxu0 %v4681_v31  ;;  %3741 = vmatpush3.bf16.msra.mxu1 %v4902_v59  ;;  %v1987_v31 = vand.u32 4294901760, %v4923_v21  ;;  %v5376_v20 = vand.u32 4294901760, %v5034_v11 }
 0x171   : > { %v4918_v55 = vpack.c.bf16 %v1984_v29, %v1981_v24  ;;  %v5031_v10 = vsub.f32 %v4907_v15, %v1981_v24  ;;  %v2130_v60 = vsub.f32 %v5021_v13, %v5378_v2 }
 0x172   : > { %v2144_v15 = vsub.f32 %v5034_v11, %v5376_v20  ;;  %v5048_v7 = vsub.f32 %v4923_v21, %v1987_v31 }
 0x173   : > { %3397 = vmatmul.mubr.f32.gmra.mrb[12].mxu0 %v4679_v6  ;;  %v4928_v6 = vld [vmem:[%s5349_s4 + $0x58] sm:$0xff]  ;;  %3743 = vmatprep.subr.bf16.mxu1 %v4918_v55  ;;  %v5377_v51 = vand.u32 4294901760, %v5031_v10  ;;  %v2131_v5 = vand.u32 4294901760, %v2130_v60 }
 0x174   : > { %3399 = vmatprep.mubr.f32.mxu0 %v4707_v33  ;;  %v1990_v19 = vand.u32 4294901760, %v4928_v6  ;;  %3745 = vmatpush3.bf16.msra.mxu1 %v4918_v55  ;;  %v1993_v33 = vand.u32 4294901760, %v4939_v49  ;;  %v2145_v38 = vand.u32 4294901760, %v2144_v15  ;;  %v5375_v34 = vand.u32 4294901760, %v5048_v7 }
 0x175   : > { %v2137_v45 = vsub.f32 %v5031_v10, %v5377_v51  ;;  %v5053_v29 = vpack.c.bf16 %v2131_v5, %v2124_v50  ;;  %v5113_v15 = vpack.c.bf16 %v4990_v18, %v4988_v39 }
 0x176   : > { %v4934_v58 = vpack.c.bf16 %v1990_v19, %v1987_v31  ;;  %v5051_v24 = vsub.f32 %v4928_v6, %v1990_v19  ;;  %v2151_v43 = vsub.f32 %v5048_v7, %v5375_v34  ;;  %v5068_v6 = vsub.f32 %v4939_v49, %v1993_v33 }
 0x177   : > { %3400 = vmatmul.mubr.f32.gmra.mrb[14].mxu0 %v4705_v22  ;;  %v4944_v22 = vld [vmem:[%s5349_s4 + $0x68] sm:$0xff]  ;;  %v2138_v37 = vand.u32 4294901760, %v2137_v45  ;;  %v5085_v49 = vsub.f32 %v4963_v46, %v1999_v30  ;;  %v5109_v45 = vpack.c.bf16 %v4958_v62, %v4956_v28 }
 0x178   : > { %3747 = vmatprep.subr.bf16.mxu1 %v4934_v58  ;;  %v1996_v44 = vand.u32 4294901760, %v4944_v22  ;;  %v5374_v35 = vand.u32 4294901760, %v5051_v24  ;;  %5409 = vst [vmem:[#allocation2_spill] sm:$0xff] %v5068_v6  ;;  %v2152_v19 = vand.u32 4294901760, %v2151_v43  ;;  %v5373_v53 = vand.u32 4294901760, %v5068_v6 }
 0x179   : > { %3749 = vmatpush3.bf16.msra.mxu1 %v4934_v58  ;;  %v5057_v42 = vpack.c.bf16 %v2145_v38, %v2138_v37  ;;  %5411 = vst [vmem:[#allocation4_spill] sm:$0xff] %v5085_v49  ;;  %v5371_v23 = vand.u32 4294901760, %v5085_v49  ;;  %v5117_v37 = vpack.c.bf16 %v5006_v41, %v5004_v12  ;;  %v5121_v38 = vpack.c.bf16 %v5021_v13, %v5019_v9 }
 0x17a   : > { %v4954_v48 = vpack.c.bf16 %v1996_v44, %v1993_v33  ;;  %v2158_v21 = vsub.f32 %v5051_v24, %v5374_v35  ;;  %v5073_v31 = vsub.f32 %v4944_v22, %v1996_v44  ;;  %v2165_v16 = vsub.f32 %v5068_v6, %v5373_v53 }
 0x17b   : > { %v5090_v22 = vsub.f32 %v4968_v8, %v2002_v57  ;;  %v2179_v46 = vsub.f32 %v5085_v49, %v5371_v23  ;;  %v5125_v43 = vpack.c.bf16 %v5034_v11, %v5031_v10 }
 0x17c   : > { %3751 = vmatprep.subr.bf16.mxu1 %v4954_v48  ;;  %5410 = vst [vmem:[#allocation3_spill] sm:$0xff] %v5073_v31  ;;  %v2159_v47 = vand.u32 4294901760, %v2158_v21  ;;  %v5372_v1 = vand.u32 4294901760, %v5073_v31  ;;  %v2166_v44 = vand.u32 4294901760, %v2165_v16  ;;  %v5129_v21 = vpack.c.bf16 %v5051_v24, %v5048_v7 }
 0x17d   : > { %3753 = vmatpush3.bf16.msra.mxu1 %v4954_v48  ;;  %5412 = vst [vmem:[#allocation5_spill] sm:$0xff] %v5090_v22  ;;  %v5370_v4 = vand.u32 4294901760, %v5090_v22  ;;  %v2180_v57 = vand.u32 4294901760, %v2179_v46  ;;  %v4124_v16 = vmov 1966171168  }
 0x17e   : > { %3755 = vmatprep.subr.bf16.mxu1 %v4980_v36  ;;  %v5077_v3 = vpack.c.bf16 %v2159_v47, %v2152_v19  ;;  %v2172_v33 = vsub.f32 %v5073_v31, %v5372_v1  ;;  %v5133_v19 = vpack.c.bf16 %v5073_v31, %v5068_v6  ;;  %v5137_v47 = vpack.c.bf16 %v5090_v22, %v5085_v49 }
 0x17f   : > { %v2186_v30 = vsub.f32 %v5090_v22, %v5370_v4 }
 0x180   : > { %v2173_v60 = vand.u32 4294901760, %v2172_v33  ;;  %v1830_v33 = vunpack.c.l.s4 %v4124_v16 }
 0x181   : > { %3757 = vmatpush3.bf16.msra.mxu1 %v4980_v36  ;;  %v2187_v50 = vand.u32 4294901760, %v2186_v30 }
 0x182   : > { %3759 = vmatprep.subr.bf16.mxu1 %v4996_v63  ;;  %v5103_v8 = vpack.c.bf16 %v2173_v60, %v2166_v44  ;;  %v1832_v44 = vlaneseq  ;;  %v5142_v60 = vld [vmem:[%s5348_s3] ss:$0 sm:$0xff] }
 0x183   : > { %v5105_v5 = vpack.c.bf16 %v2187_v50, %v2180_v57  ;;  %v1831_v50 = vunpack.c.0.s8 %v1830_v33 }
 0x184   : > { %v1833_v4 = vshrl.u32 %v1832_v44, 7 }
 0x186   : > { %v5148_v51 = vsub.s32 %v1831_v50, %v1833_v4 }
 0x22e   : > { %v3380_v46 = vpop.f32.mrb[0].mxu0 }
 0x22f   : > { %v1711_v30 = vpop.f32.mrb[1].mxu0  ;;  %v3918_v57 = vadd.f32 %v3380_v46, %v5142_v60 }
 0x230   : > { %v3919_v23 = vadd.f32 %v5142_v60, %v1711_v30 }
 0x231   : > { %v1806_v34 = vmax.f32 %v3918_v57, 0.0 }
 0x232   : > { %v3383_v1 = vpop.f32.mrb[2].mxu0  ;;  %v1805_v2 = vmax.f32 %v3919_v23, 0.0 }
 0x233   : > { %v3920_v53 = vadd.f32 %v3383_v1, %v5142_v60  ;;  %v1723_v35 = vpop.f32.mrb[3].mxu0 }
 0x234   : > { %v3921_v16 = vadd.f32 %v5142_v60, %v1723_v35 }
 0x235   : > { %v1808_v20 = vmax.f32 %v3920_v53, 0.0 }
 0x236   : > { %v1807_v52 = vmax.f32 %v3921_v16, 0.0  ;;  %v3386_v40 = vpop.f32.mrb[4].mxu0 }
 0x237   : > { %v1822_v54 = vadd.f32 %v1808_v20, %v1806_v34  ;;  %v1735_v32 = vpop.f32.mrb[5].mxu0  ;;  %v3922_v44 = vadd.f32 %v3386_v40, %v5142_v60 }
 0x238   : > { %v1821_v46 = vadd.f32 %v1807_v52, %v1805_v2  ;;  %v3923_v1 = vadd.f32 %v5142_v60, %v1735_v32 }
 0x239   : > { %v1842_v33 = vrot.slane %v1822_v54, %v5148_v51  ;;  %v1810_v20 = vmax.f32 %v3922_v44, 0.0 }
 0x23a   : > { %v1835_v30 = vrot.slane %v1821_v46, %v5148_v51  ;;  %v3389_v14 = vpop.f32.mrb[6].mxu0  ;;  %v1809_v2 = vmax.f32 %v3923_v1, 0.0 }
 0x23b   : > { %v1894_v35 = vrot.slane %v1842_v33, 4  ;;  %v3924_v53 = vadd.f32 %v3389_v14, %v5142_v60  ;;  %v1747_v4 = vpop.f32.mrb[7].mxu0 }
 0x23c   : > { %v1893_v57 = vrot.slane %v1835_v30, 4  ;;  %v3925_v23 = vadd.f32 %v5142_v60, %v1747_v4 }
 0x23d   : > { %v1910_v50 = vadd.f32 %v1894_v35, %v1842_v33  ;;  %v1812_v34 = vmax.f32 %v3924_v53, 0.0 }
 0x23e   : > { %v1909_v52 = vadd.f32 %v1893_v57, %v1835_v30  ;;  %v1811_v54 = vmax.f32 %v3925_v23, 0.0  ;;  %v3392_v16 = vpop.f32.mrb[8].mxu0 }
 0x23f   : > { %v1824_v40 = vadd.f32 %v1812_v34, %v1810_v20  ;;  %v1759_v17 = vpop.f32.mrb[9].mxu0  ;;  %v3926_v22 = vadd.f32 %v3392_v16, %v5142_v60 }
 0x240   : > { %v1823_v46 = vadd.f32 %v1811_v54, %v1809_v2  ;;  %v1948_v25 = vcombine.low %v1909_v52, %v1910_v50  ;;  %v3927_v49 = vadd.f32 %v5142_v60, %v1759_v17 }
 0x241   : > { %v1856_v32 = vrot.slane %v1824_v40, %v5148_v51  ;;  %v1814_v50 = vmax.f32 %v3926_v22, 0.0 }
 0x242   : > { %v1849_v14 = vrot.slane %v1823_v46, %v5148_v51  ;;  %v3395_v4 = vpop.f32.mrb[10].mxu0  ;;  %v5160_v33 = vand.u32 4294901760, %v1948_v25  ;;  %v1813_v52 = vmax.f32 %v3927_v49, 0.0 }
 0x243   : > { %v1896_v44 = vrot.slane %v1856_v32, 4  ;;  %v3928_v30 = vadd.f32 %v3395_v4, %v5142_v60  ;;  %v1771_v1 = vpop.f32.mrb[11].mxu0 }
 0x244   : > { %v1895_v35 = vrot.slane %v1849_v14, 4  ;;  %v3929_v53 = vadd.f32 %v5142_v60, %v1771_v1  ;;  %v5165_v57 = vsub.f32 %v1948_v25, %v5160_v33 }
 0x245   : > { %v1912_v23 = vadd.f32 %v1896_v44, %v1856_v32  ;;  %v1816_v20 = vmax.f32 %v3928_v30, 0.0 }
 0x246   : > { %v1911_v34 = vadd.f32 %v1895_v35, %v1849_v14  ;;  %v1815_v2 = vmax.f32 %v3929_v53, 0.0  ;;  %v3398_v17 = vpop.f32.mrb[12].mxu0  ;;  %v5388_v54 = vand.u32 4294901760, %v5165_v57 }
 0x247   : > { %v1826_v16 = vadd.f32 %v1816_v20, %v1814_v50  ;;  %v1783_v40 = vpop.f32.mrb[13].mxu0  ;;  %v3930_v32 = vadd.f32 %v3398_v17, %v5142_v60 }
 0x248   : > { %v1949_v46 = vcombine.low %v1911_v34, %v1912_v23  ;;  %v1825_v4 = vadd.f32 %v1815_v2, %v1813_v52  ;;  %v2040_v1 = vsub.f32 %v5165_v57, %v5388_v54  ;;  %v3931_v14 = vadd.f32 %v5142_v60, %v1783_v40 }
 0x249   : > { %v1870_v25 = vrot.slane %v1826_v16, %v5148_v51  ;;  %v1818_v2 = vmax.f32 %v3930_v32, 0.0 }
 0x24a   : > { %v5173_v22 = vand.u32 4294901760, %v1949_v46  ;;  %v1863_v49 = vrot.slane %v1825_v4, %v5148_v51  ;;  %v3401_v44 = vpop.f32.mrb[14].mxu0  ;;  %v2041_v30 = vand.u32 4294901760, %v2040_v1  ;;  %v1817_v4 = vmax.f32 %v3931_v14, 0.0 }
 0x24b   : > { %v1898_v35 = vrot.slane %v1870_v25, 4  ;;  %v3932_v53 = vadd.f32 %v3401_v44, %v5142_v60  ;;  %v1795_v23 = vpop.f32.mrb[15].mxu0 }
 0x24c   : > { %v1897_v50 = vrot.slane %v1863_v49, 4  ;;  %v3933_v20 = vadd.f32 %v5142_v60, %v1795_v23  ;;  %3434 = vmatprep.mubr.f32.mxu1 %v2041_v30  ;;  %v5180_v34 = vsub.f32 %v1949_v46, %v5173_v22 }
 0x24d   : > { %v1914_v52 = vadd.f32 %v1898_v35, %v1870_v25  ;;  %v1820_v17 = vmax.f32 %v3932_v53, 0.0 }
 0x24e   : > { %v1913_v16 = vadd.f32 %v1897_v50, %v1863_v49  ;;  %v1819_v54 = vmax.f32 %v3933_v20, 0.0  ;;  %v2049_v40 = vand.u32 4294901760, %v5180_v34 }
 0x24f   : > { %v1828_v1 = vadd.f32 %v1820_v17, %v1818_v2 }
 0x250   : > { %v1950_v31 = vcombine.low %v1913_v16, %v1914_v52  ;;  %v1827_v6 = vadd.f32 %v1819_v54, %v1817_v4  ;;  %v2050_v44 = vsub.f32 %v5180_v34, %v2049_v40 }
 0x251   : > { %v1884_v60 = vrot.slane %v1828_v1, %v5148_v51 }
 0x252   : > { %v5187_v30 = vand.u32 4294901760, %v1950_v31  ;;  %v1877_v46 = vrot.slane %v1827_v6, %v5148_v51  ;;  %v2051_v25 = vand.u32 4294901760, %v2050_v44 }
 0x253   : > { %v1900_v32 = vrot.slane %v1884_v60, 4 }
 0x254   : > { %v1899_v49 = vrot.slane %v1877_v46, 4  ;;  %3435 = vmatmul.mubr.f32.vlgmr.msra.gmra.mrb[0].mxu1 %v2051_v25  ;;  %v5191_v14 = vsub.f32 %v1950_v31, %v5187_v30 }
 0x255   : > { %v1916_v35 = vadd.f32 %v1900_v32, %v1884_v60  ;;  %3761 = vmatpush3.bf16.msra.mxu1 %v4996_v63 }
 0x256   : > { %v1915_v54 = vadd.f32 %v1899_v49, %v1877_v46  ;;  %3763 = vmatprep.subr.bf16.mxu1 %v5011_v61  ;;  %v2059_v53 = vand.u32 4294901760, %v5191_v14 }
 0x258   : > { %v1951_v23 = vcombine.low %v1915_v54, %v1916_v35  ;;  %v2060_v51 = vsub.f32 %v5191_v14, %v2059_v53 }
 0x259   : > { %3765 = vmatpush3.bf16.msra.mxu1 %v5011_v61 }
 0x25a   : > { %v5200_v6 = vand.u32 4294901760, %v1951_v23  ;;  %3767 = vmatprep.subr.bf16.mxu1 %v5025_v0  ;;  %v2061_v31 = vand.u32 4294901760, %v2060_v51 }
 0x25c   : > { %3437 = vmatprep.mubr.f32.mxu1 %v2061_v31  ;;  %v5204_v63 = vsub.f32 %v1951_v23, %v5200_v6 }
 0x25d   : > { %3769 = vmatpush3.bf16.msra.mxu1 %v5025_v0  ;;  %v5413_v0 = vand.u32 4294901760, %v5165_v57 }
 0x25e   : > { %3771 = vmatprep.subr.bf16.mxu1 %v5053_v29  ;;  %v2069_v50 = vand.u32 4294901760, %v5204_v63 }
 0x260   : > { %v2070_v20 = vsub.f32 %v5204_v63, %v2069_v50 }
 0x261   : > { %3773 = vmatpush3.bf16.msra.mxu1 %v5053_v29  ;;  %v5414_v29 = vand.u32 4294901760, %v4956_v28  ;;  %v5418_v28 = vand.u32 4294901760, %v5004_v12 }
 0x262   : > { %3775 = vmatprep.subr.bf16.mxu1 %v5057_v42  ;;  %v2071_v61 = vand.u32 4294901760, %v2070_v20 }
 0x264   : > { %3438 = vmatmul.mubr.f32.gmra.mrb[2].mxu1 %v2071_v61 }
 0x265   : > { %3777 = vmatpush3.bf16.msra.mxu1 %v5057_v42  ;;  %3472 = vmatprep.mubr.f32.mxu1 %v5160_v33  ;;  %v5415_v42 = vand.u32 4294901760, %v4958_v62  ;;  %v5419_v62 = vand.u32 4294901760, %v5006_v41  ;;  %v5424_v41 = vand.u32 4294901760, %v5048_v7 }
 0x266   : > { %3779 = vmatprep.subr.bf16.mxu1 %v5077_v3 }
 0x269   : > { %3781 = vmatpush3.bf16.msra.mxu1 %v5077_v3  ;;  %v3854_v3 = vpack.c.bf16 %v5415_v42, %v5414_v29 }
 0x26a   : > { %3783 = vmatprep.subr.bf16.mxu1 %v5103_v8 }
 0x26d   : > { %3785 = vmatpush3.bf16.msra.mxu1 %v5103_v8  ;;  %v5416_v8 = vand.u32 4294901760, %v4988_v39  ;;  %v5420_v39 = vand.u32 4294901760, %v5019_v9  ;;  %v5426_v9 = vld [vmem:[#allocation2_spill] sm:$0xff] }
 0x26e   : > { %3787 = vmatprep.subr.bf16.mxu1 %v5105_v5 }
 0x271   : > { %3789 = vmatpush3.bf16.msra.mxu1 %v5105_v5  ;;  %v5417_v5 = vand.u32 4294901760, %v4990_v18  ;;  %v5421_v18 = vand.u32 4294901760, %v5021_v13  ;;  %v5428_v13 = vld [vmem:[#allocation3_spill] sm:$0xff] }
 0x272   : > { %3791 = vmatprep.subr.bf16.mxu1 %v5109_v45 }
 0x274   : > { %3473 = vmatmul.mubr.f32.vlgmr.msra.gmra.mrb[0].mxu1 %v5173_v22 }
 0x275   : > { %3475 = vmatprep.mubr.f32.mxu1 %v5187_v30  ;;  %3793 = vmatpush3.bf16.msra.mxu1 %v5109_v45  ;;  %v3858_v45 = vpack.c.bf16 %v5417_v5, %v5416_v8 }
 0x276   : > { %3795 = vmatprep.subr.bf16.mxu1 %v5113_v15 }
 0x278   : > { %3476 = vmatmul.mubr.f32.gmra.mrb[2].mxu1 %v5200_v6 }
 0x279   : > { %3797 = vmatpush3.bf16.msra.mxu1 %v5113_v15  ;;  %3510 = vmatprep.mubr.f32.mxu1 %v5165_v57  ;;  %v3862_v15 = vpack.c.bf16 %v5419_v62, %v5418_v28  ;;  %v5429_v57 = vand.u32 4294901760, %v5428_v13 }
 0x27a   : > { %3799 = vmatprep.subr.bf16.mxu1 %v5117_v37 }
 0x27d   : > { %3801 = vmatpush3.bf16.msra.mxu1 %v5117_v37  ;;  %v3866_v37 = vpack.c.bf16 %v5421_v18, %v5420_v39 }
 0x27e   : > { %3803 = vmatprep.subr.bf16.mxu1 %v5121_v38 }
 0x281   : > { %3805 = vmatpush3.bf16.msra.mxu1 %v5121_v38  ;;  %v5422_v38 = vand.u32 4294901760, %v5031_v10  ;;  %v5430_v10 = vld [vmem:[#allocation4_spill] sm:$0xff] }
 0x282   : > { %3807 = vmatprep.subr.bf16.mxu1 %v5125_v43  ;;  %v5431_v52 = vand.u32 4294901760, %v5430_v10 }
 0x285   : > { %3809 = vmatpush3.bf16.msra.mxu1 %v5125_v43  ;;  %v5423_v43 = vand.u32 4294901760, %v5034_v11  ;;  %v5432_v11 = vld [vmem:[#allocation5_spill] sm:$0xff] }
 0x286   : > { %3811 = vmatprep.subr.bf16.mxu1 %v5129_v21  ;;  %v5433_v2 = vand.u32 4294901760, %v5432_v11 }
 0x287   : > { %v3870_v12 = vpack.c.bf16 %v5423_v43, %v5422_v38 }
 0x288   : > { %v3882_v17 = vpack.c.bf16 %v5433_v2, %v5431_v52 }
 0x289   : > { %3813 = vmatpush3.bf16.msra.mxu1 %v5129_v21  ;;  %v5425_v21 = vand.u32 4294901760, %v5051_v24 }
 0x28a   : > { %3815 = vmatprep.subr.bf16.mxu1 %v5133_v19 }
 0x28d   : > { %3817 = vmatpush3.bf16.msra.mxu1 %v5133_v19  ;;  %v3874_v19 = vpack.c.bf16 %v5425_v21, %v5424_v41 }
 0x28e   : > { %3819 = vmatprep.subr.bf16.mxu1 %v5137_v47 }
 0x291   : > { %3821 = vmatpush3.bf16.msra.mxu1 %v5137_v47  ;;  %v5427_v47 = vand.u32 4294901760, %v5426_v9 }
 0x292   : > { %3823 = vmatprep.subr.bf16.mxu1 %v4872_v27 }
 0x294   : > { %3511 = vmatmul.mubr.f32.vlgmr.msra.gmra.mrb[0].mxu1 %v5180_v34  ;;  %v3878_v34 = vpack.c.bf16 %v5429_v57, %v5427_v47 }
 0x295   : > { %3513 = vmatprep.mubr.f32.mxu1 %v5191_v14  ;;  %3825 = vmatpush3.bf16.msra.mxu1 %v4872_v27 }
 0x296   : > { %3827 = vmatprep.subr.bf16.mxu1 %v4882_v56 }
 0x298   : > { %3514 = vmatmul.mubr.f32.gmra.mrb[2].mxu1 %v5204_v63 }
 0x299   : > { %3829 = vmatpush3.bf16.msra.mxu1 %v4882_v56  ;;  %3548 = vmatprep.mubr.f32.mxu1 %v5413_v0 }
 0x29a   : > { %3831 = vmatprep.subr.bf16.mxu1 %v4892_v26 }
 0x29d   : > { %3833 = vmatpush3.bf16.msra.mxu1 %v4892_v26 }
 0x29e   : > { %3835 = vmatprep.subr.bf16.mxu1 %v4902_v59 }
 0x2a1   : > { %3837 = vmatpush3.bf16.msra.mxu1 %v4902_v59 }
 0x2a2   : > { %3839 = vmatprep.subr.bf16.mxu1 %v4918_v55 }
 0x2a5   : > { %3841 = vmatpush3.bf16.msra.mxu1 %v4918_v55 }
 0x2a6   : > { %3843 = vmatprep.subr.bf16.mxu1 %v4934_v58 }
 0x2a9   : > { %3845 = vmatpush3.bf16.msra.mxu1 %v4934_v58 }
 0x2aa   : > { %3847 = vmatprep.subr.bf16.mxu1 %v4954_v48 }
 0x2ad   : > { %3849 = vmatpush3.bf16.msra.mxu1 %v4954_v48 }
 0x2ae   : > { %3851 = vmatprep.subr.bf16.mxu1 %v4980_v36 }
 0x2b1   : > { %3853 = vmatpush3.bf16.msra.mxu1 %v4980_v36 }
 0x2b2   : > { %3855 = vmatprep.subr.bf16.mxu1 %v3854_v3 }
 0x2b4   : > { %3549 = vmatmul.mubr.f32.vlgmr.msra.gmra.mrb[0].mxu1 %v2049_v40 }
 0x2b5   : > { %3551 = vmatprep.mubr.f32.mxu1 %v2059_v53  ;;  %3857 = vmatpush3.bf16.msra.mxu1 %v3854_v3 }
 0x2b6   : > { %3859 = vmatprep.subr.bf16.mxu1 %v3858_v45 }
 0x2b8   : > { %3552 = vmatmul.mubr.f32.gmra.mrb[2].mxu1 %v2069_v50 }
 0x2b9   : > { %3861 = vmatpush3.bf16.msra.mxu1 %v3858_v45  ;;  %3586 = vmatprep.mubr.f32.mxu1 %v5160_v33 }
 0x2ba   : > { %3863 = vmatprep.subr.bf16.mxu1 %v3862_v15 }
 0x2bd   : > { %3865 = vmatpush3.bf16.msra.mxu1 %v3862_v15 }
 0x2be   : > { %3867 = vmatprep.subr.bf16.mxu1 %v3866_v37 }
 0x2c1   : > { %3869 = vmatpush3.bf16.msra.mxu1 %v3866_v37 }
 0x2c2   : > { %3871 = vmatprep.subr.bf16.mxu1 %v3870_v12 }
 0x2c5   : > { %3873 = vmatpush3.bf16.msra.mxu1 %v3870_v12 }
 0x2c6   : > { %3875 = vmatprep.subr.bf16.mxu1 %v3874_v19 }
 0x2c9   : > { %3877 = vmatpush3.bf16.msra.mxu1 %v3874_v19 }
 0x2ca   : > { %3879 = vmatprep.subr.bf16.mxu1 %v3878_v34 }
 0x2cd   : > { %3881 = vmatpush3.bf16.msra.mxu1 %v3878_v34 }
 0x2ce   : > { %3883 = vmatprep.subr.bf16.mxu1 %v3882_v17 }
 0x2d1   : > { %3885 = vmatpush3.bf16.msra.mxu1 %v3882_v17 }
 0x2d2   : > { %3887 = vmatprep.subr.bf16.mxu1 %v4872_v27 }
 0x2d4   : > { %3587 = vmatmul.mubr.f32.vlgmr.msra.gmra.mrb[0].mxu1 %v5173_v22 }
 0x2d5   : > { %3589 = vmatprep.mubr.f32.mxu1 %v5187_v30  ;;  %3889 = vmatpush3.bf16.msra.mxu1 %v4872_v27  ;;  %v2868_v27 = vld [vmem:[%s5350_s5] ss:$0 sm:$0xff] }
 0x2d6   : > { %3891 = vmatprep.subr.bf16.mxu1 %v4882_v56 }
 0x2d8   : > { %3590 = vmatmul.mubr.f32.gmra.mrb[2].mxu1 %v5200_v6 }
 0x2d9   : > { %3893 = vmatpush3.bf16.msra.mxu1 %v4882_v56  ;;  %3624 = vmatprep.mubr.f32.mxu1 %v5160_v33 }
 0x2da   : > { %3895 = vmatprep.subr.bf16.mxu1 %v4892_v26 }
 0x2dd   : > { %3897 = vmatpush3.bf16.msra.mxu1 %v4892_v26 }
 0x2de   : > { %3899 = vmatprep.subr.bf16.mxu1 %v4902_v59 }
 0x2e1   : > { %3901 = vmatpush3.bf16.msra.mxu1 %v4902_v59 }
 0x2e2   : > { %3903 = vmatprep.subr.bf16.mxu1 %v4918_v55 }
 0x2e5   : > { %3905 = vmatpush3.bf16.msra.mxu1 %v4918_v55 }
 0x2e6   : > { %3907 = vmatprep.subr.bf16.mxu1 %v4934_v58 }
 0x2e9   : > { %3909 = vmatpush3.bf16.msra.mxu1 %v4934_v58 }
 0x2ea   : > { %3911 = vmatprep.subr.bf16.mxu1 %v4954_v48 }
 0x2ed   : > { %3913 = vmatpush3.bf16.msra.mxu1 %v4954_v48 }
 0x2ee   : > { %3915 = vmatprep.subr.bf16.mxu1 %v4980_v36 }
 0x2f1   : > { %3917 = vmatpush3.bf16.msra.mxu1 %v4980_v36 }
 0x2f4   : > { %3625 = vmatmul.mubr.f32.vlgmr.msra.gmra.mrb[0].mxu1 %v5173_v22 }
 0x2f5   : > { %3627 = vmatprep.mubr.f32.mxu1 %v5187_v30 }
 0x2f8   : > { %3628 = vmatmul.mubr.f32.gmra.mrb[2].mxu1 %v5200_v6 }
 0x3c7   : > { %v3626_v56 = vpop.f32.mrb[0].mxu1 }
 0x3c8   : > { %v3934_v26 = vadd.f32 %v3626_v56, %v2868_v27  ;;  %v2704_v59 = vpop.f32.mrb[1].mxu1 }
 0x3c9   : > { %v3935_v55 = vadd.f32 %v2868_v27, %v2704_v59 }
 0x3ca   : > { %v2727_v58 = vmax.f32 %v3934_v26, 0.0 }
 0x3cb   : > { %v2726_v48 = vmax.f32 %v3935_v55, 0.0  ;;  %v3629_v36 = vpop.f32.mrb[2].mxu1 }
 0x3cc   : > { %2731 = vst [vmem:[%s370_s15 + $0x8] sm:$0xff] %v2727_v58  ;;  %v3936_v7 = vadd.f32 %v3629_v36, %v2868_v27  ;;  %v2716_v24 = vpop.f32.mrb[3].mxu1 }
 0x3cd   : > { %2730 = vst [vmem:[%s370_s15] sm:$0xff] %v2726_v48  ;;  %v3937_v33 = vadd.f32 %v2868_v27, %v2716_v24 }
 0x3ce   : > { %v2729_v22 = vmax.f32 %v3936_v7, 0.0 }
 0x3cf   : > { %v2728_v16 = vmax.f32 %v3937_v33, 0.0 }
 0x3d0   : > { %2733 = vst [vmem:[%s370_s15 + $0x18] sm:$0xff] %v2729_v22 }
 0x3d1   : > { %2732 = vst [vmem:[%s370_s15 + $0x10] sm:$0xff] %v2728_v16 }
 0x3d2 PF: > { %s16_s25 = sadd.s32 1, %s4120_s25   ;;  %s5434_s21 = smov %s4112_s23 }
 0x3d3   : > { %p13_p9 = scmp.ge.s32.totalorder %s16_s25, 6   ;;  %s5435_s22 = smov %s4116_s24 }
 0x3d4   : > { %s5436_s23 = smov %s5439_s26  ;;  %s5437_s24 = smov %s5443_s27 }
 0x3d5   :  { %15 = sbr.rel (!%p13_p9) target bundleno = 3 (0x3), region = 77 }

</bundles_post_ra>
